<compile_context>
chip_gen: v5e
topology: v5e:2x2
jax: 0.10.0
libtpu: 0.0.40
codegen_flags: <defaults>
</compile_context>

<pallas_src>
import functools

import jax
import jax.numpy as jnp
from jax.experimental import pallas as pl
from jax.experimental.pallas import tpu as pltpu


def _gwnet_gcn_kernel(x_ref, adj_ref, w_ref, b_ref, out_ref, h_ref, *,
                      c_in, support_len, order, b_tile, n_nodes):
    """Fused graph-conv + concat + 1x1 conv for one tile of b_tile (V, C) slabs.

    x_ref   : (b_tile*c_in, V)       rows ordered (slab, channel), compute dtype
    adj_ref : order==1 -> A_cat (V, S*V)   (all supports fused, no transpose)
              order> 1 -> supports (S, V, V)
    w_ref   : (c_out, c_total)       PyTorch Conv2d-1x1 weight layout
    b_ref   : (c_out, 1)             bias (f32)
    out_ref : (c_out, b_tile*V)      lane-dense output slab
    h_ref   : (c_total, b_tile*V)    VMEM scratch with the concatenated blocks
    """
    C = c_in
    V = n_nodes
    S = support_len
    cdt = h_ref.dtype

    # ---- identity block of the concat: straight ref->ref slice copies ------
    for b in range(b_tile):                                # static, unrolled
        h_ref[0:C, b * V:(b + 1) * V] = x_ref[b * C:(b + 1) * C, :]

    if order == 1:
        # ---- ALL supports in ONE MXU pass: (b_tile*C, V) @ (V, S*V) ---------
        y = jnp.dot(x_ref[...], adj_ref[...],
                    preferred_element_type=jnp.float32).astype(cdt)
        for s in range(S):
            for b in range(b_tile):
                h_ref[(1 + s) * C:(2 + s) * C, b * V:(b + 1) * V] = \
                    y[b * C:(b + 1) * C, s * V:(s + 1) * V]
    else:
        # ---- chained hops per support; carry x1 in f32, cast only at the ----
        # ---- MXU input / h store so higher-order error does not compound ----
        for s in range(S):
            x1 = jnp.dot(x_ref[...], adj_ref[s],
                         preferred_element_type=jnp.float32)      # f32 carry
            for k in range(order):
                if k > 0:
                    x1 = jnp.dot(x1.astype(cdt), adj_ref[s],
                                 preferred_element_type=jnp.float32)
                blk = 1 + s * order + k
                for b in range(b_tile):
                    h_ref[blk * C:(blk + 1) * C, b * V:(b + 1) * V] = \
                        x1[b * C:(b + 1) * C, :].astype(cdt)

    # ---- single K = c_total 1x1 conv + bias (f32 accumulate, f32 add) ------
    out = jnp.dot(w_ref[...], h_ref[...],
                  preferred_element_type=jnp.float32)   # (c_out, b_tile*V)
    # TODO(synk): F.dropout in training mode not applied; eval-mode identity.
    out_ref[...] = (out + b_ref[...]).astype(out_ref.dtype)


def gwnet_gcn_forward(x, supports, weight, bias, *, order=1, b_tile=8,
                      compute_dtype=jnp.bfloat16):
    """x: [N, C, V, L], supports: [S, V, V], weight: [c_out, (order*S+1)*C]
    (PyTorch Conv2d-1x1 layout), bias: [c_out].  Returns [N, c_out, V, L].

    compute_dtype is the MXU-input dtype (default bf16 on all generations);
    accumulation and the bias add are always f32.
    """
    N, C, V, L = x.shape
    S = supports.shape[0]
    c_out, c_total = weight.shape
    # h scratch is never zero-initialized; every (blk, b) slice is written
    # exactly once, which relies on this shape relation.
    assert c_total == (order * S + 1) * C

    b_tile = max(int(b_tile), 1)
    B = N * L
    Bp = pl.cdiv(B, b_tile) * b_tile       # pad slab count (no gcd perf cliff)
    Vp = pl.cdiv(V, 128) * 128             # lane-pad node dim (e.g. V=207)

    # Wrapper-side layout plumbing (pure XLA, outside the kernel):
    #   x[n, c, v, l] -> Xq[(n*L + l)*C + c, v], zero-padded to (Bp*C, Vp).
    xq = jnp.transpose(x, (0, 3, 1, 2)).reshape(B * C, V)
    xq = jnp.pad(xq, ((0, (Bp - B) * C), (0, Vp - V))).astype(compute_dtype)

    supp_p = jnp.pad(supports,
                     ((0, 0), (0, Vp - V), (0, Vp - V))).astype(compute_dtype)
    if order == 1:
        # A_cat[v, s*Vp + w] = supports[s, v, w]  ->  one fused nconv matmul.
        adj = jnp.transpose(supp_p, (1, 0, 2)).reshape(Vp, S * Vp)
        adj_spec = pl.BlockSpec((Vp, S * Vp), lambda i: (0, 0))
    else:
        adj = supp_p
        adj_spec = pl.BlockSpec((S, Vp, Vp), lambda i: (0, 0, 0))

    w = weight.astype(compute_dtype)                 # PyTorch layout, no W.T
    b2 = bias.astype(jnp.float32).reshape(c_out, 1)

    out_itemsize = jnp.dtype(x.dtype).itemsize
    flops = 2.0 * B * C * V * V * S * order + 2.0 * c_out * c_total * B * V
    bytes_accessed = (xq.size * xq.dtype.itemsize
                      + adj.size * adj.dtype.itemsize
                      + w.size * w.dtype.itemsize
                      + b2.size * 4
                      + c_out * Bp * Vp * out_itemsize)

    kernel = functools.partial(
        _gwnet_gcn_kernel, c_in=C, support_len=S, order=order,
        b_tile=b_tile, n_nodes=Vp)

    out_cv = pl.pallas_call(
        kernel,
        out_shape=jax.ShapeDtypeStruct((c_out, Bp * Vp), x.dtype),
        grid_spec=pltpu.PrefetchScalarGridSpec(
            num_scalar_prefetch=0,
            grid=(Bp // b_tile,),
            in_specs=[
                pl.BlockSpec((b_tile * C, Vp), lambda i: (i, 0)),
                adj_spec,
                pl.BlockSpec((c_out, c_total), lambda i: (0, 0)),
                pl.BlockSpec((c_out, 1), lambda i: (0, 0)),
            ],
            out_specs=pl.BlockSpec((c_out, b_tile * Vp), lambda i: (0, i)),
            scratch_shapes=[pltpu.VMEM((c_total, b_tile * Vp), compute_dtype)],
        ),
        compiler_params=pltpu.CompilerParams(
            dimension_semantics=("parallel",),
        ),
        cost_estimate=pl.CostEstimate(
            flops=int(flops),
            transcendentals=0,
            bytes_accessed=int(bytes_accessed)),
    )(xq, adj, w, b2)

    # (c_out, Bp*Vp) -> trim padding -> (N, c_out, V, L)
    out = out_cv.reshape(c_out, Bp, Vp)[:, :B, :V]
    return jnp.transpose(out.reshape(c_out, N, L, V), (1, 0, 3, 2))


def gwnet_gcn_reference(x, supports, weight, bias, *, order=1):
    """Pure-JAX reference mirroring the PyTorch forward (eval mode)."""
    out = [x]
    for s in range(supports.shape[0]):
        a = supports[s]
        x1 = jnp.einsum('ncvl,vw->ncwl', x, a)
        out.append(x1)
        for _k in range(2, order + 1):
            x2 = jnp.einsum('ncvl,vw->ncwl', x1, a)
            out.append(x2)
            x1 = x2
    h = jnp.concatenate(out, axis=1)                   # (N, c_total, V, L)
    y = jnp.einsum('nkvl,ok->novl', h, weight)
    return y + bias.reshape(1, -1, 1, 1)


def _make_inputs(key, N, C, V, L, S, order, c_out):
    c_total = (order * S + 1) * C
    kx, ka, kw, kb = jax.random.split(key, 4)
    x = jax.random.normal(kx, (N, C, V, L), dtype=jnp.float32)
    # magnitude-preserving random supports (stand-in for normalized adjacency)
    supports = jax.random.normal(ka, (S, V, V), dtype=jnp.float32) / jnp.sqrt(
        jnp.float32(V))
    # Conv2d(1x1)-style init: U(-1/sqrt(fan_in), 1/sqrt(fan_in))
    bound = 1.0 / jnp.sqrt(jnp.float32(c_total))
    weight = jax.random.uniform(kw, (c_out, c_total), jnp.float32, -bound, bound)
    bias = jax.random.uniform(kb, (c_out,), jnp.float32, -bound, bound)
    return x, supports, weight, bias


if __name__ == "__main__":
    # 1) gwnet-like shapes: dilation_channels=32, support_len=3, order=1,
    #    residual_channels(c_out)=32, V=128 nodes, N=2, L=32
    #    -> B = 64 slabs, b_tile=8 -> 8 grid steps (>=4 per TC on v7x).
    N, C, V, L, S, order, c_out = 2, 32, 128, 32, 3, 1, 32
    x, supports, weight, bias = _make_inputs(
        jax.random.PRNGKey(0), N, C, V, L, S, order, c_out)
    ref = gwnet_gcn_reference(x, supports, weight, bias, order=order)

    # default bf16 MXU inputs / f32 accumulate (loose tolerance)
    out_bf16 = jax.block_until_ready(
        gwnet_gcn_forward(x, supports, weight, bias, order=order))
    assert out_bf16.shape == (N, c_out, V, L)
    assert jnp.allclose(out_bf16, ref, atol=2e-1, rtol=1e-1), \
        "bf16 mismatch vs reference"

    # f32 path (tight check)
    out_f32 = jax.block_until_ready(
        gwnet_gcn_forward(x, supports, weight, bias, order=order,
                          compute_dtype=jnp.float32))
    assert jnp.allclose(out_f32, ref, atol=2e-3, rtol=2e-3), \
        "f32 mismatch vs reference"

    # 2) ragged shapes: V not a multiple of 128, B not a multiple of b_tile
    #    (exercises the lane-padding / slab-padding paths).
    N, C, V, L, S, order, c_out = 2, 32, 120, 5, 3, 1, 32
    x, supports, weight, bias = _make_inputs(
        jax.random.PRNGKey(1), N, C, V, L, S, order, c_out)
    ref = gwnet_gcn_reference(x, supports, weight, bias, order=order)
    out_rag = jax.block_until_ready(
        gwnet_gcn_forward(x, supports, weight, bias, order=order,
                          compute_dtype=jnp.float32))
    assert out_rag.shape == (N, c_out, V, L)
    assert jnp.allclose(out_rag, ref, atol=2e-3, rtol=2e-3), \
        "ragged f32 mismatch vs reference"

    # 3) order > 1 (chained-hop path, f32 carry).
    N, C, V, L, S, order, c_out = 2, 32, 128, 8, 2, 2, 32
    x, supports, weight, bias = _make_inputs(
        jax.random.PRNGKey(2), N, C, V, L, S, order, c_out)
    ref = gwnet_gcn_reference(x, supports, weight, bias, order=order)
    out_o2 = jax.block_until_ready(
        gwnet_gcn_forward(x, supports, weight, bias, order=order,
                          compute_dtype=jnp.float32))
    assert jnp.allclose(out_o2, ref, atol=2e-3, rtol=2e-3), \
        "order>1 f32 mismatch vs reference"

    print("KERNEL_OK")
</pallas_src>

<mosaic_0001>
module attributes {stable_mosaic.version = 11 : i64} {
  func.func @_gwnet_gcn_kernel(%arg0: i32, %arg1: memref<256x128xbf16, #tpu.memory_space<vmem>>, %arg2: memref<128x384xbf16, #tpu.memory_space<vmem>>, %arg3: memref<32x128xbf16, #tpu.memory_space<vmem>>, %arg4: memref<32x1xf32, #tpu.memory_space<vmem>>, %arg5: memref<32x1024xf32, #tpu.memory_space<vmem>>, %arg6: memref<128x1024xbf16, #tpu.memory_space<vmem>>) attributes {dimension_semantics = [#tpu.dimension_semantics<parallel>], iteration_bounds = array<i64: 8>, scalar_prefetch = 0 : i64, scratch_operands = 1 : i64, tpu.core_type = #tpu.core_type<tc>, window_params = [{transform_indices = @transform_0, window_bounds = array<i64: 256, 128>}, {pipeline_mode = #tpu.pipeline_mode<synchronous>, transform_indices = @transform_1, window_bounds = array<i64: 128, 384>}, {pipeline_mode = #tpu.pipeline_mode<synchronous>, transform_indices = @transform_2, window_bounds = array<i64: 32, 128>}, {pipeline_mode = #tpu.pipeline_mode<synchronous>, transform_indices = @transform_3, window_bounds = array<i64: 32, 1>}, {transform_indices = @transform_4, window_bounds = array<i64: 32, 1024>}]} {
    %c0 = arith.constant 0 : index
    %c0_0 = arith.constant 0 : index
    %0 = vector.load %arg1[%c0, %c0_0] : memref<256x128xbf16, #tpu.memory_space<vmem>>, vector<32x128xbf16>
    %c0_1 = arith.constant 0 : index
    %c0_2 = arith.constant 0 : index
    %1 = vector.load %arg6[%c0_1, %c0_2] : memref<128x1024xbf16, #tpu.memory_space<vmem>>, vector<32x128xbf16>
    tpu.vector_store %arg6[%c0_1, %c0_2], %0 {strides = array<i32>} : memref<128x1024xbf16, #tpu.memory_space<vmem>>, vector<32x128xbf16>,
    %c32 = arith.constant 32 : index
    %c0_3 = arith.constant 0 : index
    %2 = vector.load %arg1[%c32, %c0_3] : memref<256x128xbf16, #tpu.memory_space<vmem>>, vector<32x128xbf16>
    %c0_4 = arith.constant 0 : index
    %c128 = arith.constant 128 : index
    %3 = vector.load %arg6[%c0_4, %c128] : memref<128x1024xbf16, #tpu.memory_space<vmem>>, vector<32x128xbf16>
    tpu.vector_store %arg6[%c0_4, %c128], %2 {strides = array<i32>} : memref<128x1024xbf16, #tpu.memory_space<vmem>>, vector<32x128xbf16>,
    %c64 = arith.constant 64 : index
    %c0_5 = arith.constant 0 : index
    %4 = vector.load %arg1[%c64, %c0_5] : memref<256x128xbf16, #tpu.memory_space<vmem>>, vector<32x128xbf16>
    %c0_6 = arith.constant 0 : index
    %c256 = arith.constant 256 : index
    %5 = vector.load %arg6[%c0_6, %c256] : memref<128x1024xbf16, #tpu.memory_space<vmem>>, vector<32x128xbf16>
    tpu.vector_store %arg6[%c0_6, %c256], %4 {strides = array<i32>} : memref<128x1024xbf16, #tpu.memory_space<vmem>>, vector<32x128xbf16>,
    %c96 = arith.constant 96 : index
    %c0_7 = arith.constant 0 : index
    %6 = vector.load %arg1[%c96, %c0_7] : memref<256x128xbf16, #tpu.memory_space<vmem>>, vector<32x128xbf16>
    %c0_8 = arith.constant 0 : index
    %c384 = arith.constant 384 : index
    %7 = vector.load %arg6[%c0_8, %c384] : memref<128x1024xbf16, #tpu.memory_space<vmem>>, vector<32x128xbf16>
    tpu.vector_store %arg6[%c0_8, %c384], %6 {strides = array<i32>} : memref<128x1024xbf16, #tpu.memory_space<vmem>>, vector<32x128xbf16>,
    %c128_9 = arith.constant 128 : index
    %c0_10 = arith.constant 0 : index
    %8 = vector.load %arg1[%c128_9, %c0_10] : memref<256x128xbf16, #tpu.memory_space<vmem>>, vector<32x128xbf16>
    %c0_11 = arith.constant 0 : index
    %c512 = arith.constant 512 : index
    %9 = vector.load %arg6[%c0_11, %c512] : memref<128x1024xbf16, #tpu.memory_space<vmem>>, vector<32x128xbf16>
    tpu.vector_store %arg6[%c0_11, %c512], %8 {strides = array<i32>} : memref<128x1024xbf16, #tpu.memory_space<vmem>>, vector<32x128xbf16>,
    %c160 = arith.constant 160 : index
    %c0_12 = arith.constant 0 : index
    %10 = vector.load %arg1[%c160, %c0_12] : memref<256x128xbf16, #tpu.memory_space<vmem>>, vector<32x128xbf16>
    %c0_13 = arith.constant 0 : index
    %c640 = arith.constant 640 : index
    %11 = vector.load %arg6[%c0_13, %c640] : memref<128x1024xbf16, #tpu.memory_space<vmem>>, vector<32x128xbf16>
    tpu.vector_store %arg6[%c0_13, %c640], %10 {strides = array<i32>} : memref<128x1024xbf16, #tpu.memory_space<vmem>>, vector<32x128xbf16>,
    %c192 = arith.constant 192 : index
    %c0_14 = arith.constant 0 : index
    %12 = vector.load %arg1[%c192, %c0_14] : memref<256x128xbf16, #tpu.memory_space<vmem>>, vector<32x128xbf16>
    %c0_15 = arith.constant 0 : index
    %c768 = arith.constant 768 : index
    %13 = vector.load %arg6[%c0_15, %c768] : memref<128x1024xbf16, #tpu.memory_space<vmem>>, vector<32x128xbf16>
    tpu.vector_store %arg6[%c0_15, %c768], %12 {strides = array<i32>} : memref<128x1024xbf16, #tpu.memory_space<vmem>>, vector<32x128xbf16>,
    %c224 = arith.constant 224 : index
    %c0_16 = arith.constant 0 : index
    %14 = vector.load %arg1[%c224, %c0_16] : memref<256x128xbf16, #tpu.memory_space<vmem>>, vector<32x128xbf16>
    %c0_17 = arith.constant 0 : index
    %c896 = arith.constant 896 : index
    %15 = vector.load %arg6[%c0_17, %c896] : memref<128x1024xbf16, #tpu.memory_space<vmem>>, vector<32x128xbf16>
    tpu.vector_store %arg6[%c0_17, %c896], %14 {strides = array<i32>} : memref<128x1024xbf16, #tpu.memory_space<vmem>>, vector<32x128xbf16>,
    %c0_18 = arith.constant 0 : index
    %c0_19 = arith.constant 0 : index
    %16 = vector.load %arg1[%c0_18, %c0_19] : memref<256x128xbf16, #tpu.memory_space<vmem>>, vector<256x128xbf16>
    %c0_20 = arith.constant 0 : index
    %c0_21 = arith.constant 0 : index
    %17 = vector.load %arg2[%c0_20, %c0_21] : memref<128x384xbf16, #tpu.memory_space<vmem>>, vector<128x384xbf16>
    %cst = arith.constant dense<0.000000e+00> : vector<256x384xf32>
    %18 = tpu.matmul %16, %17, %cst {dimension_numbers = #tpu.dot_dimension_numbers<[1], [0], [0], [1], [0, 0, 1, 1], [], []>} : vector<256x128xbf16>, vector<128x384xbf16>, vector<256x384xf32> -> vector<256x384xf32>
    %19 = arith.truncf %18 : vector<256x384xf32> to vector<256x384xbf16>
    %20 = vector.extract_strided_slice %19 {offsets = [0, 0], sizes = [32, 128], strides = [1, 1]} : vector<256x384xbf16> to vector<32x128xbf16>
    %c32_22 = arith.constant 32 : index
    %c0_23 = arith.constant 0 : index
    %21 = vector.load %arg6[%c32_22, %c0_23] : memref<128x1024xbf16, #tpu.memory_space<vmem>>, vector<32x128xbf16>
    tpu.vector_store %arg6[%c32_22, %c0_23], %20 {strides = array<i32>} : memref<128x1024xbf16, #tpu.memory_space<vmem>>, vector<32x128xbf16>,
    %22 = vector.extract_strided_slice %19 {offsets = [32, 0], sizes = [32, 128], strides = [1, 1]} : vector<256x384xbf16> to vector<32x128xbf16>
    %c32_24 = arith.constant 32 : index
    %c128_25 = arith.constant 128 : index
    %23 = vector.load %arg6[%c32_24, %c128_25] : memref<128x1024xbf16, #tpu.memory_space<vmem>>, vector<32x128xbf16>
    tpu.vector_store %arg6[%c32_24, %c128_25], %22 {strides = array<i32>} : memref<128x1024xbf16, #tpu.memory_space<vmem>>, vector<32x128xbf16>,
    %24 = vector.extract_strided_slice %19 {offsets = [64, 0], sizes = [32, 128], strides = [1, 1]} : vector<256x384xbf16> to vector<32x128xbf16>
    %c32_26 = arith.constant 32 : index
    %c256_27 = arith.constant 256 : index
    %25 = vector.load %arg6[%c32_26, %c256_27] : memref<128x1024xbf16, #tpu.memory_space<vmem>>, vector<32x128xbf16>
    tpu.vector_store %arg6[%c32_26, %c256_27], %24 {strides = array<i32>} : memref<128x1024xbf16, #tpu.memory_space<vmem>>, vector<32x128xbf16>,
    %26 = vector.extract_strided_slice %19 {offsets = [96, 0], sizes = [32, 128], strides = [1, 1]} : vector<256x384xbf16> to vector<32x128xbf16>
    %c32_28 = arith.constant 32 : index
    %c384_29 = arith.constant 384 : index
    %27 = vector.load %arg6[%c32_28, %c384_29] : memref<128x1024xbf16, #tpu.memory_space<vmem>>, vector<32x128xbf16>
    tpu.vector_store %arg6[%c32_28, %c384_29], %26 {strides = array<i32>} : memref<128x1024xbf16, #tpu.memory_space<vmem>>, vector<32x128xbf16>,
    %28 = vector.extract_strided_slice %19 {offsets = [128, 0], sizes = [32, 128], strides = [1, 1]} : vector<256x384xbf16> to vector<32x128xbf16>
    %c32_30 = arith.constant 32 : index
    %c512_31 = arith.constant 512 : index
    %29 = vector.load %arg6[%c32_30, %c512_31] : memref<128x1024xbf16, #tpu.memory_space<vmem>>, vector<32x128xbf16>
    tpu.vector_store %arg6[%c32_30, %c512_31], %28 {strides = array<i32>} : memref<128x1024xbf16, #tpu.memory_space<vmem>>, vector<32x128xbf16>,
    %30 = vector.extract_strided_slice %19 {offsets = [160, 0], sizes = [32, 128], strides = [1, 1]} : vector<256x384xbf16> to vector<32x128xbf16>
    %c32_32 = arith.constant 32 : index
    %c640_33 = arith.constant 640 : index
    %31 = vector.load %arg6[%c32_32, %c640_33] : memref<128x1024xbf16, #tpu.memory_space<vmem>>, vector<32x128xbf16>
    tpu.vector_store %arg6[%c32_32, %c640_33], %30 {strides = array<i32>} : memref<128x1024xbf16, #tpu.memory_space<vmem>>, vector<32x128xbf16>,
    %32 = vector.extract_strided_slice %19 {offsets = [192, 0], sizes = [32, 128], strides = [1, 1]} : vector<256x384xbf16> to vector<32x128xbf16>
    %c32_34 = arith.constant 32 : index
    %c768_35 = arith.constant 768 : index
    %33 = vector.load %arg6[%c32_34, %c768_35] : memref<128x1024xbf16, #tpu.memory_space<vmem>>, vector<32x128xbf16>
    tpu.vector_store %arg6[%c32_34, %c768_35], %32 {strides = array<i32>} : memref<128x1024xbf16, #tpu.memory_space<vmem>>, vector<32x128xbf16>,
    %34 = vector.extract_strided_slice %19 {offsets = [224, 0], sizes = [32, 128], strides = [1, 1]} : vector<256x384xbf16> to vector<32x128xbf16>
    %c32_36 = arith.constant 32 : index
    %c896_37 = arith.constant 896 : index
    %35 = vector.load %arg6[%c32_36, %c896_37] : memref<128x1024xbf16, #tpu.memory_space<vmem>>, vector<32x128xbf16>
    tpu.vector_store %arg6[%c32_36, %c896_37], %34 {strides = array<i32>} : memref<128x1024xbf16, #tpu.memory_space<vmem>>, vector<32x128xbf16>,
    %36 = vector.extract_strided_slice %19 {offsets = [0, 128], sizes = [32, 128], strides = [1, 1]} : vector<256x384xbf16> to vector<32x128xbf16>
    %c64_38 = arith.constant 64 : index
    %c0_39 = arith.constant 0 : index
    %37 = vector.load %arg6[%c64_38, %c0_39] : memref<128x1024xbf16, #tpu.memory_space<vmem>>, vector<32x128xbf16>
    tpu.vector_store %arg6[%c64_38, %c0_39], %36 {strides = array<i32>} : memref<128x1024xbf16, #tpu.memory_space<vmem>>, vector<32x128xbf16>,
    %38 = vector.extract_strided_slice %19 {offsets = [32, 128], sizes = [32, 128], strides = [1, 1]} : vector<256x384xbf16> to vector<32x128xbf16>
    %c64_40 = arith.constant 64 : index
    %c128_41 = arith.constant 128 : index
    %39 = vector.load %arg6[%c64_40, %c128_41] : memref<128x1024xbf16, #tpu.memory_space<vmem>>, vector<32x128xbf16>
    tpu.vector_store %arg6[%c64_40, %c128_41], %38 {strides = array<i32>} : memref<128x1024xbf16, #tpu.memory_space<vmem>>, vector<32x128xbf16>,
    %40 = vector.extract_strided_slice %19 {offsets = [64, 128], sizes = [32, 128], strides = [1, 1]} : vector<256x384xbf16> to vector<32x128xbf16>
    %c64_42 = arith.constant 64 : index
    %c256_43 = arith.constant 256 : index
    %41 = vector.load %arg6[%c64_42, %c256_43] : memref<128x1024xbf16, #tpu.memory_space<vmem>>, vector<32x128xbf16>
    tpu.vector_store %arg6[%c64_42, %c256_43], %40 {strides = array<i32>} : memref<128x1024xbf16, #tpu.memory_space<vmem>>, vector<32x128xbf16>,
    %42 = vector.extract_strided_slice %19 {offsets = [96, 128], sizes = [32, 128], strides = [1, 1]} : vector<256x384xbf16> to vector<32x128xbf16>
    %c64_44 = arith.constant 64 : index
    %c384_45 = arith.constant 384 : index
    %43 = vector.load %arg6[%c64_44, %c384_45] : memref<128x1024xbf16, #tpu.memory_space<vmem>>, vector<32x128xbf16>
    tpu.vector_store %arg6[%c64_44, %c384_45], %42 {strides = array<i32>} : memref<128x1024xbf16, #tpu.memory_space<vmem>>, vector<32x128xbf16>,
    %44 = vector.extract_strided_slice %19 {offsets = [128, 128], sizes = [32, 128], strides = [1, 1]} : vector<256x384xbf16> to vector<32x128xbf16>
    %c64_46 = arith.constant 64 : index
    %c512_47 = arith.constant 512 : index
    %45 = vector.load %arg6[%c64_46, %c512_47] : memref<128x1024xbf16, #tpu.memory_space<vmem>>, vector<32x128xbf16>
    tpu.vector_store %arg6[%c64_46, %c512_47], %44 {strides = array<i32>} : memref<128x1024xbf16, #tpu.memory_space<vmem>>, vector<32x128xbf16>,
    %46 = vector.extract_strided_slice %19 {offsets = [160, 128], sizes = [32, 128], strides = [1, 1]} : vector<256x384xbf16> to vector<32x128xbf16>
    %c64_48 = arith.constant 64 : index
    %c640_49 = arith.constant 640 : index
    %47 = vector.load %arg6[%c64_48, %c640_49] : memref<128x1024xbf16, #tpu.memory_space<vmem>>, vector<32x128xbf16>
    tpu.vector_store %arg6[%c64_48, %c640_49], %46 {strides = array<i32>} : memref<128x1024xbf16, #tpu.memory_space<vmem>>, vector<32x128xbf16>,
    %48 = vector.extract_strided_slice %19 {offsets = [192, 128], sizes = [32, 128], strides = [1, 1]} : vector<256x384xbf16> to vector<32x128xbf16>
    %c64_50 = arith.constant 64 : index
    %c768_51 = arith.constant 768 : index
    %49 = vector.load %arg6[%c64_50, %c768_51] : memref<128x1024xbf16, #tpu.memory_space<vmem>>, vector<32x128xbf16>
    tpu.vector_store %arg6[%c64_50, %c768_51], %48 {strides = array<i32>} : memref<128x1024xbf16, #tpu.memory_space<vmem>>, vector<32x128xbf16>,
    %50 = vector.extract_strided_slice %19 {offsets = [224, 128], sizes = [32, 128], strides = [1, 1]} : vector<256x384xbf16> to vector<32x128xbf16>
    %c64_52 = arith.constant 64 : index
    %c896_53 = arith.constant 896 : index
    %51 = vector.load %arg6[%c64_52, %c896_53] : memref<128x1024xbf16, #tpu.memory_space<vmem>>, vector<32x128xbf16>
    tpu.vector_store %arg6[%c64_52, %c896_53], %50 {strides = array<i32>} : memref<128x1024xbf16, #tpu.memory_space<vmem>>, vector<32x128xbf16>,
    %52 = vector.extract_strided_slice %19 {offsets = [0, 256], sizes = [32, 128], strides = [1, 1]} : vector<256x384xbf16> to vector<32x128xbf16>
    %c96_54 = arith.constant 96 : index
    %c0_55 = arith.constant 0 : index
    %53 = vector.load %arg6[%c96_54, %c0_55] : memref<128x1024xbf16, #tpu.memory_space<vmem>>, vector<32x128xbf16>
    tpu.vector_store %arg6[%c96_54, %c0_55], %52 {strides = array<i32>} : memref<128x1024xbf16, #tpu.memory_space<vmem>>, vector<32x128xbf16>,
    %54 = vector.extract_strided_slice %19 {offsets = [32, 256], sizes = [32, 128], strides = [1, 1]} : vector<256x384xbf16> to vector<32x128xbf16>
    %c96_56 = arith.constant 96 : index
    %c128_57 = arith.constant 128 : index
    %55 = vector.load %arg6[%c96_56, %c128_57] : memref<128x1024xbf16, #tpu.memory_space<vmem>>, vector<32x128xbf16>
    tpu.vector_store %arg6[%c96_56, %c128_57], %54 {strides = array<i32>} : memref<128x1024xbf16, #tpu.memory_space<vmem>>, vector<32x128xbf16>,
    %56 = vector.extract_strided_slice %19 {offsets = [64, 256], sizes = [32, 128], strides = [1, 1]} : vector<256x384xbf16> to vector<32x128xbf16>
    %c96_58 = arith.constant 96 : index
    %c256_59 = arith.constant 256 : index
    %57 = vector.load %arg6[%c96_58, %c256_59] : memref<128x1024xbf16, #tpu.memory_space<vmem>>, vector<32x128xbf16>
    tpu.vector_store %arg6[%c96_58, %c256_59], %56 {strides = array<i32>} : memref<128x1024xbf16, #tpu.memory_space<vmem>>, vector<32x128xbf16>,
    %58 = vector.extract_strided_slice %19 {offsets = [96, 256], sizes = [32, 128], strides = [1, 1]} : vector<256x384xbf16> to vector<32x128xbf16>
    %c96_60 = arith.constant 96 : index
    %c384_61 = arith.constant 384 : index
    %59 = vector.load %arg6[%c96_60, %c384_61] : memref<128x1024xbf16, #tpu.memory_space<vmem>>, vector<32x128xbf16>
    tpu.vector_store %arg6[%c96_60, %c384_61], %58 {strides = array<i32>} : memref<128x1024xbf16, #tpu.memory_space<vmem>>, vector<32x128xbf16>,
    %60 = vector.extract_strided_slice %19 {offsets = [128, 256], sizes = [32, 128], strides = [1, 1]} : vector<256x384xbf16> to vector<32x128xbf16>
    %c96_62 = arith.constant 96 : index
    %c512_63 = arith.constant 512 : index
    %61 = vector.load %arg6[%c96_62, %c512_63] : memref<128x1024xbf16, #tpu.memory_space<vmem>>, vector<32x128xbf16>
    tpu.vector_store %arg6[%c96_62, %c512_63], %60 {strides = array<i32>} : memref<128x1024xbf16, #tpu.memory_space<vmem>>, vector<32x128xbf16>,
    %62 = vector.extract_strided_slice %19 {offsets = [160, 256], sizes = [32, 128], strides = [1, 1]} : vector<256x384xbf16> to vector<32x128xbf16>
    %c96_64 = arith.constant 96 : index
    %c640_65 = arith.constant 640 : index
    %63 = vector.load %arg6[%c96_64, %c640_65] : memref<128x1024xbf16, #tpu.memory_space<vmem>>, vector<32x128xbf16>
    tpu.vector_store %arg6[%c96_64, %c640_65], %62 {strides = array<i32>} : memref<128x1024xbf16, #tpu.memory_space<vmem>>, vector<32x128xbf16>,
    %64 = vector.extract_strided_slice %19 {offsets = [192, 256], sizes = [32, 128], strides = [1, 1]} : vector<256x384xbf16> to vector<32x128xbf16>
    %c96_66 = arith.constant 96 : index
    %c768_67 = arith.constant 768 : index
    %65 = vector.load %arg6[%c96_66, %c768_67] : memref<128x1024xbf16, #tpu.memory_space<vmem>>, vector<32x128xbf16>
    tpu.vector_store %arg6[%c96_66, %c768_67], %64 {strides = array<i32>} : memref<128x1024xbf16, #tpu.memory_space<vmem>>, vector<32x128xbf16>,
    %66 = vector.extract_strided_slice %19 {offsets = [224, 256], sizes = [32, 128], strides = [1, 1]} : vector<256x384xbf16> to vector<32x128xbf16>
    %c96_68 = arith.constant 96 : index
    %c896_69 = arith.constant 896 : index
    %67 = vector.load %arg6[%c96_68, %c896_69] : memref<128x1024xbf16, #tpu.memory_space<vmem>>, vector<32x128xbf16>
    tpu.vector_store %arg6[%c96_68, %c896_69], %66 {strides = array<i32>} : memref<128x1024xbf16, #tpu.memory_space<vmem>>, vector<32x128xbf16>,
    %c0_70 = arith.constant 0 : index
    %c0_71 = arith.constant 0 : index
    %68 = vector.load %arg3[%c0_70, %c0_71] : memref<32x128xbf16, #tpu.memory_space<vmem>>, vector<32x128xbf16>
    %c0_72 = arith.constant 0 : index
    %c0_73 = arith.constant 0 : index
    %69 = vector.load %arg6[%c0_72, %c0_73] : memref<128x1024xbf16, #tpu.memory_space<vmem>>, vector<128x1024xbf16>
    %cst_74 = arith.constant dense<0.000000e+00> : vector<32x1024xf32>
    %70 = tpu.matmul %68, %69, %cst_74 {dimension_numbers = #tpu.dot_dimension_numbers<[1], [0], [0], [1], [0, 0, 1, 1], [], []>} : vector<32x128xbf16>, vector<128x1024xbf16>, vector<32x1024xf32> -> vector<32x1024xf32>
    %c0_75 = arith.constant 0 : index
    %c0_76 = arith.constant 0 : index
    %71 = vector.load %arg4[%c0_75, %c0_76] : memref<32x1xf32, #tpu.memory_space<vmem>>, vector<32x1xf32>
    %72 = vector.broadcast %71 : vector<32x1xf32> to vector<32x1024xf32>
    %73 = arith.addf %70, %72 : vector<32x1024xf32>
    %c0_77 = arith.constant 0 : index
    %c0_78 = arith.constant 0 : index
    %74 = vector.load %arg5[%c0_77, %c0_78] : memref<32x1024xf32, #tpu.memory_space<vmem>>, vector<32x1024xf32>
    tpu.vector_store %arg5[%c0_77, %c0_78], %73 {strides = array<i32>} : memref<32x1024xf32, #tpu.memory_space<vmem>>, vector<32x1024xf32>,
    return
  }
  func.func @transform_0(%arg0: i32) -> (i32, i32) {
    %c0_i32 = arith.constant 0 : i32
    %c0_i32_0 = arith.constant 0 : i32
    return %arg0, %c0_i32 : i32, i32
  }
  func.func @transform_1(%arg0: i32) -> (i32, i32) {
    %c0_i32 = arith.constant 0 : i32
    %c0_i32_0 = arith.constant 0 : i32
    %c0_i32_1 = arith.constant 0 : i32
    return %c0_i32, %c0_i32_0 : i32, i32
  }
  func.func @transform_2(%arg0: i32) -> (i32, i32) {
    %c0_i32 = arith.constant 0 : i32
    %c0_i32_0 = arith.constant 0 : i32
    %c0_i32_1 = arith.constant 0 : i32
    return %c0_i32, %c0_i32_0 : i32, i32
  }
  func.func @transform_3(%arg0: i32) -> (i32, i32) {
    %c0_i32 = arith.constant 0 : i32
    %c0_i32_0 = arith.constant 0 : i32
    %c0_i32_1 = arith.constant 0 : i32
    return %c0_i32, %c0_i32_0 : i32, i32
  }
  func.func @transform_4(%arg0: i32) -> (i32, i32) {
    %c0_i32 = arith.constant 0 : i32
    %c0_i32_0 = arith.constant 0 : i32
    return %c0_i32, %arg0 : i32, i32
  }
}

</mosaic_0001>

<bundles_post_ra>
// kernel: tpu_custom_call.1
= control target key start
LH: loop header
LB: loop body
LE: loop exit
PB: predicated region body
PF: predicated region fallthrough
CT: control target
= control target key end

     0   :  { %9 = vsyncpa [#allocation4], 0  ;;  %s3178_s0 = inlined_call_operand.hbm [shape: bf16[2048,128], index: 0, kind: input, shape index: {}]   ;;  %s3179_s1 = inlined_call_operand.hbm [shape: bf16[128,384], index: 1, kind: input, shape index: {}]   ;;  %s3180_s2 = inlined_call_operand.vmem [shape: bf16[32,128], index: 2, kind: input, shape index: {}]   ;;  %s3181_s3 = inlined_call_operand.vmem [shape: f32[32,1], index: 3, kind: input, shape index: {}]   ;;  %s3182_s4 = inlined_call_operand.hbm [shape: f32[32,8192], index: 4, kind: output, shape index: {}]  }
   0x1   :  { %11 = vsyncpa [#allocation4 + $0x1], 0 }
   0x2   :  { %12 = vsyncpa [#allocation7], 0 }
   0x3   :  { %13 = vsyncpa [#allocation5], 0 }
   0x4   :  { %15 = vsyncpa [#allocation5 + $0x1], 0  ;;  %s2792_s15 = smov 0   ;;  %s2794_s16 = smov 0  }
   0x5   :  { %s2796_s17 = smov 0   ;;  %s2798_s18 = smov 0  }
   0x6 LB: > { %s2813_s19 = sadd.s32 4294967295, %s2756_s18   ;;  %s1819_s20 = sadd.s32 4294967294, %s2756_s18   ;;  %s2756_s18 = sphi %s2798_s18, %s3191_s18   ;;  %s2752_s17 = sphi %s2796_s17, %s3190_s17   ;;  %s2748_s16 = sphi %s2794_s16, %s3189_s16   ;;  %s2744_s15 = sphi %s2792_s15, %s3188_s15  }
   0x7   : > { %p41_p0 = scmp.ne.s32.totalorder %s2748_s16, %s2744_s15  ;;  %p42_p1 = scmp.eq.s32.totalorder %s2813_s19, 0 }
   0x8   : > { %p128_p2 = scmp.eq.s32.totalorder %s2813_s19, 7  ;;  %p134_p3 = scmp.eq.s32.totalorder %s1819_s20, 7 }
   0x9   : > { %p2822_p4 = por %p42_p1, %p41_p0  ;;  %p1820_p5 = scmp.ge.s32.totalorder %s2756_s18, 1 }
   0xa   : > { %p2827_p6 = por %p134_p3, %p41_p0  ;;  %p141_p7 = scmp.lt.s32.totalorder %s2756_s18, 9 }
   0xb   : > { %s152_s25 = sshll.u32 %s3179_s1, 4  ;;  %s2758_s27 = smov [#allocation6]   ;;  %s153_s25 = int_to_ptr.hbm [resolvable:$true] %s152_s25 }
   0xc   : > { %p2835_p8 = pnand %p1820_p5, %p141_p7  ;;  %s154_s28 = sshll.u32 %s2758_s27, 4  ;;  %s155_s28 = int_to_ptr.vmem [resolvable:$true] %s154_s28 }
   0xd   : > { %s2844_s29 = sadd.s32 1, %s2756_s18   ;;  %s2759_s30 = smov 192  }
   0xe   : > { %p2567_p9 = pneg %p2835_p8  ;;  %s2760_s5 = smov 12  }
   0xf   : > { %s25_s6 = ssub.s32 %s2756_s18, %s2844_s29  ;;  %s28_s7 = sadd.s32 1, %s2752_s17 }
  0x10   : > { %p2568_p10 = pnand %p2567_p9, %p42_p1  ;;  %p26_p11 = scmp.eq.s32.totalorder %s25_s6, 0 }
  0x11   : > { %p35_p12 = scmp.ne.s32.totalorder %s2752_s17, %s2748_s16  ;;  %p36_p13 = scmp.eq.s32.totalorder %s2756_s18, 0 }
  0x12   : > { %2570 = dma.hbm_to_vmem [thread:$0]  (!%p2568_p10), %s153_s25, 3072, %s155_s28, [#allocation7], %s2759_s30, %s2759_s30, %s2760_s5  }
  0x13   : > { %p2580_p0 = scmp.lt.s32.totalorder %s2756_s18, 8  ;;  %p37_p3 = por %p36_p13, %p35_p12 }
  0x14   : > { %s2854_s8 = scalar_select %p26_p11, %s2752_s17, %s28_s7  }
  0x15   : > { %p2858_p5 = por %p128_p2, %p35_p12  ;;  %s174_s10 = sand.u32 1, %s2752_s17  }
  0x16   : > { %s2259_s11 = sshll.u32 %s2756_s18, 7  ;;  %s1823_s12 = sshll.u32 %s174_s10, 7 }
  0x17   : > { %s183_s20 = scalar_lea.hbm %s3178_s0, %s2259_s11  ;;  %s178_s24 = scalar_lea.vmem [#allocation3], %s1823_s12 }
  0x18   : > { %s184_s23 = sshll.u32 %s183_s20, 4  ;;  %s186_s25 = sshll.u32 %s178_s24, 4  ;;  %s185_s23 = int_to_ptr.hbm [resolvable:$true] %s184_s23  ;;  %s187_s25 = int_to_ptr.vmem [resolvable:$true] %s186_s25 }
  0x19   : > { %p2869_p7 = pnand %p2580_p0, %p37_p3  ;;  %s175_s28 = scalar_lea.sflag [#allocation4], %s174_s10 }
  0x1a   : > { %s2656_s30 = sshra.s32 %s185_s23, 4  ;;  %s2663_s11 = scalar_lea.hbm %s3178_s0, 1024  ;;  %s2657_s30 = int_to_ptr.hbm [resolvable:$true] %s2656_s30 }
  0x1b   : > { %s2658_s5 = scalar_lea.hbm %s2657_s30, 128  ;;  %p2660_p9 = pneg %p2869_p7 }
  0x1c   : > { %p2659_p2 = scmp.ne.s32.totalorder %s2657_s30, %s2658_s5  ;;  %p2664_p12 = scmp.lt.s32.totalorder %s2657_s30, %s3178_s0 }
  0x1d   : > { %p2665_p13 = scmp.lt.s32.totalorder %s2663_s11, %s2658_s5 }
  0x1e   : > { %p2661_p10 = pnand %p2660_p9, %p2659_p2 }
  0x1f   : > { %p2666_p0 = por %p2665_p13, %p2664_p12 }
  0x20   : > { %p2662_p11 = pneg %p2661_p10 }
  0x22   : > { %p2667_p3 = pnand %p2666_p0, %p2662_p11 }
  0x24   : > { %2670 = shalt.err (!%p2667_p3)
}
  0x25   : > { %s2761_s10 = smov 64   ;;  %s2762_s14 = smov 4  }
  0x26   : > { %2574 = dma.hbm_to_vmem [thread:$0]  (!%p2869_p7), %s185_s23, 2048, %s187_s25, %s175_s28, %s2761_s10, %s2761_s10, %s2762_s14  }
  0x27   : > { %198 = sbr.rel (%p2835_p8) target bundleno = 700 (0x2bc), region = 36  ;;  %s2886_s20 = sand.u32 (!%p2835_p8), 1, %s2748_s16  }
  0x28   : > { %s1827_s24 = sshll.u32 (!%p2835_p8), %s2886_s20, 7  ;;  %s201_s30 = scalar_lea.sflag (!%p2835_p8), [#allocation4], %s2886_s20 }
  0x29   : > { %s2890_s5 = scalar_lea.vmem (!%p2835_p8), [#allocation3], %s1827_s24 }
  0x2c   : > { %2731 = dma.done.wait (%p2822_p4), %s201_s30, 2048  }
  0x2d   : > { %2733 = vsyncadd (%p2822_p4), %s201_s30, 4294965248 }
  0x2e   : > { %2735 = dma.done.wait (%p42_p1), [#allocation7], 3072  }
  0x2f   : > { %2737 = vsyncadd (%p42_p1), [#allocation7], 4294964224  ;;  %v1980_v0 = vld [vmem:[#allocation6 + $0xa8] sm:$0xf]  ;;  %v2298_v1 = vld [vmem:[#allocation6 + $0xb0] sm:$0xf0] }
  0x30   : > { %v1988_v2 = vld [vmem:[#allocation6 + $0xb0] sm:$0xf]  ;;  %v1981_v3 = vor.u32 %v2298_v1, %v1980_v0  ;;  %v2299_v4 = vld [vmem:[#allocation6 + $0xb8] sm:$0xf0]  ;;  %v1976_v8 = vld [vmem:[#allocation6 + $0x98] sm:$0xf] }
  0x31   : > { %v1968_v5 = vld [vmem:[#allocation6 + $0x90] sm:$0xf]  ;;  %v2295_v6 = vld [vmem:[#allocation6 + $0x98] sm:$0xf0]  ;;  %v1989_v7 = vor.u32 %v2299_v4, %v1988_v2  ;;  %v2296_v9 = vld [vmem:[#allocation6 + $0xa0] sm:$0xf0] }
  0x32   : > { %589 = vmatpush.bf16.msra.mxu0 %v1981_v3  ;;  %v1969_v10 = vor.u32 %v2295_v6, %v1968_v5  ;;  %v1977_v11 = vor.u32 %v2296_v9, %v1976_v8  ;;  %v1956_v12 = vld [vmem:[#allocation6 + $0x78] sm:$0xf]  ;;  %v2292_v13 = vld [vmem:[#allocation6 + $0x80] sm:$0xf0]  ;;  %v1964_v14 = vld [vmem:[#allocation6 + $0x80] sm:$0xf] }
  0x33   : > { %767 = vmatpush.bf16.msra.mxu2 %v1989_v7  ;;  %v2293_v15 = vld [vmem:[#allocation6 + $0x88] sm:$0xf0]  ;;  %v1982_v17 = vld [vmem:[#allocation6 + $0xb4] sm:$0xf0]  ;;  %v1957_v19 = vor.u32 %v2292_v13, %v1956_v12  ;;  %v2294_v20 = vld [vmem:[#allocation6 + $0x94] sm:$0xf] }
  0x34   : > { %v2297_v16 = vld [vmem:[#allocation6 + $0xac] sm:$0xf]  ;;  %v1970_v21 = vld [vmem:[#allocation6 + $0x9c] sm:$0xf0]  ;;  %v1965_v22 = vor.u32 %v2293_v15, %v1964_v14  ;;  %v1952_v25 = vld [vmem:[#allocation6 + $0x68] sm:$0xf] }
  0x35   : > { %v1985_v18 = vor.u32 %v2297_v16, %v1982_v17  ;;  %v1944_v23 = vld [vmem:[#allocation6 + $0x60] sm:$0xf]  ;;  %v2289_v24 = vld [vmem:[#allocation6 + $0x68] sm:$0xf0]  ;;  %v1973_v26 = vor.u32 %v2294_v20, %v1970_v21  ;;  %v2290_v27 = vld [vmem:[#allocation6 + $0x70] sm:$0xf0] }
  0x36   : > { %590 = vmatpush.bf16.msra.mxu0 %v1969_v10  ;;  %v2291_v28 = vld [vmem:[#allocation6 + $0x7c] sm:$0xf]  ;;  %v1958_v29 = vld [vmem:[#allocation6 + $0x84] sm:$0xf0]  ;;  %v1945_v30 = vor.u32 %v2289_v24, %v1944_v23  ;;  %v1953_v31 = vor.u32 %v2290_v27, %v1952_v25  ;;  %v2286_v33 = vld [vmem:[#allocation6 + $0x50] sm:$0xf0] }
  0x37   : > { %768 = vmatpush.bf16.msra.mxu2 %v1977_v11  ;;  %678 = vmatpush.bf16.msra.mxu1 %v1985_v18  ;;  %v1932_v32 = vld [vmem:[#allocation6 + $0x48] sm:$0xf]  ;;  %v1940_v34 = vld [vmem:[#allocation6 + $0x50] sm:$0xf]  ;;  %v1961_v35 = vor.u32 %v2291_v28, %v1958_v29  ;;  %v2287_v36 = vld [vmem:[#allocation6 + $0x58] sm:$0xf0] }
  0x38   : > { %v2288_v37 = vld [vmem:[#allocation6 + $0x64] sm:$0xf]  ;;  %v1946_v38 = vld [vmem:[#allocation6 + $0x6c] sm:$0xf0]  ;;  %v1933_v39 = vor.u32 %v2286_v33, %v1932_v32  ;;  %v1941_v40 = vor.u32 %v2287_v36, %v1940_v34  ;;  %v2283_v42 = vld [vmem:[#allocation6 + $0x38] sm:$0xf0] }
  0x39   : > { %v1920_v41 = vld [vmem:[#allocation6 + $0x30] sm:$0xf]  ;;  %v1928_v43 = vld [vmem:[#allocation6 + $0x38] sm:$0xf]  ;;  %v1949_v44 = vor.u32 %v2288_v37, %v1946_v38  ;;  %v2284_v45 = vld [vmem:[#allocation6 + $0x40] sm:$0xf0] }
  0x3a   : > { %591 = vmatpush.bf16.msra.mxu0 %v1957_v19  ;;  %v2285_v46 = vld [vmem:[#allocation6 + $0x4c] sm:$0xf]  ;;  %v1934_v47 = vld [vmem:[#allocation6 + $0x54] sm:$0xf0]  ;;  %v1921_v48 = vor.u32 %v2283_v42, %v1920_v41  ;;  %v1929_v49 = vor.u32 %v2284_v45, %v1928_v43  ;;  %v2280_v51 = vld [vmem:[#allocation6 + $0x20] sm:$0xf0] }
  0x3b   : > { %769 = vmatpush.bf16.msra.mxu2 %v1965_v22  ;;  %679 = vmatpush.bf16.msra.mxu1 %v1973_v26  ;;  %v1908_v50 = vld [vmem:[#allocation6 + $0x18] sm:$0xf]  ;;  %v1916_v52 = vld [vmem:[#allocation6 + $0x20] sm:$0xf]  ;;  %v1937_v53 = vor.u32 %v2285_v46, %v1934_v47  ;;  %v2281_v54 = vld [vmem:[#allocation6 + $0x28] sm:$0xf0] }
  0x3c   : > { %v2282_v55 = vld [vmem:[#allocation6 + $0x34] sm:$0xf]  ;;  %v1922_v56 = vld [vmem:[#allocation6 + $0x3c] sm:$0xf0]  ;;  %v1909_v57 = vor.u32 %v2280_v51, %v1908_v50  ;;  %v1917_v58 = vor.u32 %v2281_v54, %v1916_v52  ;;  %v2277_v60 = vld [vmem:[#allocation6 + $0x8] sm:$0xf0] }
  0x3d   : > { %v1896_v59 = vld [vmem:[#allocation6] sm:$0xf]  ;;  %v1904_v61 = vld [vmem:[#allocation6 + $0x8] sm:$0xf]  ;;  %v1925_v62 = vor.u32 %v2282_v55, %v1922_v56  ;;  %v2278_v63 = vld [vmem:[#allocation6 + $0x10] sm:$0xf0] }
  0x3e   : > { %592 = vmatpush.bf16.msra.mxu0 %v1945_v30  ;;  %v2279_v0 = vld [vmem:[#allocation6 + $0x1c] sm:$0xf]  ;;  %v1910_v1 = vld [vmem:[#allocation6 + $0x24] sm:$0xf0]  ;;  %v1897_v2 = vor.u32 %v2277_v60, %v1896_v59  ;;  %v1905_v3 = vor.u32 %v2278_v63, %v1904_v61  ;;  %v2276_v5 = vld [vmem:[#allocation6 + $0x4] sm:$0xf] }
  0x3f   : > { %770 = vmatpush.bf16.msra.mxu2 %v1953_v31  ;;  %680 = vmatpush.bf16.msra.mxu1 %v1961_v35  ;;  %v1913_v4 = vor.u32 %v2279_v0, %v1910_v1  ;;  %v1898_v6 = vld [vmem:[#allocation6 + $0xc] sm:$0xf0]  ;;  %v2260_v7 = vld [vmem:[%s2890_s5] sm:$0xff]  ;;  %v2261_v9 = vld [vmem:[%s2890_s5 + $0x8] sm:$0xff]  ;;  %s1829_s14 = sshll.u32 %s2886_s20, 8  ;;  %s2366_s30 = sshll.u32 %s2813_s19, 6 }
  0x40   : > { %v1901_v8 = vor.u32 %v2276_v5, %v1898_v6  ;;  %v2262_v10 = vld [vmem:[%s2890_s5 + $0x10] sm:$0xff]  ;;  %v2263_v11 = vld [vmem:[%s2890_s5 + $0x18] sm:$0xff]  ;;  %v2264_v12 = vld [vmem:[%s2890_s5 + $0x20] sm:$0xff]  ;;  %s3055_s24 = scalar_lea.vmem [#allocation8], %s1829_s14  ;;  %s1732_s26 = scalar_lea.hbm %s3182_s4, %s2366_s30 }
  0x41   : > { %v2265_v13 = vld [vmem:[%s2890_s5 + $0x28] sm:$0xff]  ;;  %v2266_v14 = vld [vmem:[%s2890_s5 + $0x30] sm:$0xff]  ;;  %v2267_v15 = vld [vmem:[%s2890_s5 + $0x38] sm:$0xff]  ;;  %s1733_s23 = sshll.u32 %s3055_s24, 4  ;;  %s1735_s25 = sshll.u32 %s1732_s26, 4  ;;  %s1734_s23 = int_to_ptr.vmem [resolvable:$true] %s1733_s23  ;;  %s1736_s25 = int_to_ptr.hbm [resolvable:$true] %s1735_s25 }
  0x42   : > { %593 = vmatpush.bf16.msra.mxu0 %v1933_v39  ;;  %v2268_v16 = vld [vmem:[%s2890_s5 + $0x40] sm:$0xff]  ;;  %v2269_v26 = vld [vmem:[%s2890_s5 + $0x48] sm:$0xff]  ;;  %v2270_v37 = vld [vmem:[%s2890_s5 + $0x50] sm:$0xff]  ;;  %s1721_s27 = scalar_lea.sflag [#allocation5], %s2886_s20  ;;  %s2700_s28 = sshra.s32 %s1736_s25, 4  ;;  %s2701_s28 = int_to_ptr.hbm [resolvable:$true] %s2700_s28 }
  0x43   : > { %771 = vmatpush.bf16.msra.mxu2 %v1941_v40  ;;  %681 = vmatpush.bf16.msra.mxu1 %v1949_v44  ;;  %v2271_v51 = vld [vmem:[%s2890_s5 + $0x58] sm:$0xff]  ;;  %v239_v63 = vld [vmem:[%s2890_s5 + $0x8] sm:$0xf]  ;;  %v240_v0 = vld [vmem:[%s2890_s5 + $0xc] sm:$0xf]  ;;  %s2702_s19 = scalar_lea.hbm %s2701_s28, 256  ;;  %p2707_p7 = scmp.lt.s32.totalorder %s2701_s28, %s3182_s4 }
  0x44   : > { %243 = vst [vmem:[#allocation2 + $0x40] sm:$0xf] %v239_v63  ;;  %v2272_v6 = vld [vmem:[%s2890_s5 + $0x60] sm:$0xff]  ;;  %p2703_p1 = scmp.ne.s32.totalorder %s2701_s28, %s2702_s19  ;;  %s2706_s11 = scalar_lea.hbm %s3182_s4, 2048 }
  0x45   : > { %244 = vst [vmem:[#allocation2 + $0x60] sm:$0xf] %v240_v0  ;;  %p2708_p2 = scmp.lt.s32.totalorder %s2706_s11, %s2702_s19 }
  0x46   : > { %594 = vmatpush.bf16.msra.mxu0 %v1921_v48  ;;  %p2704_p4 = pnand %p2703_p1, %p2858_p5 }
  0x47   : > { %772 = vmatpush.bf16.msra.mxu2 %v1929_v49  ;;  %682 = vmatpush.bf16.msra.mxu1 %v1937_v53  ;;  %p2709_p9 = por %p2708_p2, %p2707_p7 }
  0x48   : > { %p2705_p8 = pneg %p2704_p4 }
  0x4a   : > { %595 = vmatpush.bf16.msra.mxu0 %v1909_v57  ;;  %p2710_p10 = pnand %p2709_p9, %p2705_p8 }
  0x4b   : > { %773 = vmatpush.bf16.msra.mxu2 %v1917_v58  ;;  %683 = vmatpush.bf16.msra.mxu1 %v1925_v62 }
  0x4e   : > { %596 = vmatpush.bf16.msra.mxu0 %v1897_v2  ;;  %v237_v2 = vld [vmem:[%s2890_s5] sm:$0xf] }
  0x4f   : > { %774 = vmatpush.bf16.msra.mxu2 %v1905_v3  ;;  %684 = vmatpush.bf16.msra.mxu1 %v1913_v4  ;;  %v238_v3 = vld [vmem:[%s2890_s5 + $0x4] sm:$0xf]  ;;  %241 = vst [vmem:[#allocation2] sm:$0xf] %v237_v2 }
  0x50   : > { %242 = vst [vmem:[#allocation2 + $0x20] sm:$0xf] %v238_v3 }
  0x51   : > { %597 = vmatmul.bf16.vlgmr.msra.gmra.mxu0 %v2260_v7 }
  0x52   : > { %775 = vmatmul.bf16.vlgmr.msra.gmra.mxu2 %v2260_v7 }
  0x53   : > { %685 = vmatpush.bf16.msra.mxu1 %v1901_v8 }
  0x56   : > { %686 = vmatmul.bf16.vlgmr.msra.gmra.mxu1 %v2260_v7 }
  0x61   : > { %602 = vmatmul.bf16.gmra.mxu0 %v2261_v9 }
  0x62   : > { %780 = vmatmul.bf16.gmra.mxu2 %v2261_v9 }
  0x66   : > { %691 = vmatmul.bf16.gmra.mxu1 %v2261_v9 }
  0x71   : > { %607 = vmatmul.bf16.gmra.mxu0 %v2262_v10 }
  0x72   : > { %785 = vmatmul.bf16.gmra.mxu2 %v2262_v10 }
  0x76   : > { %696 = vmatmul.bf16.gmra.mxu1 %v2262_v10 }
  0x81   : > { %612 = vmatmul.bf16.gmra.mxu0 %v2263_v11 }
  0x82   : > { %790 = vmatmul.bf16.gmra.mxu2 %v2263_v11 }
  0x86   : > { %701 = vmatmul.bf16.gmra.mxu1 %v2263_v11 }
  0x91   : > { %617 = vmatmul.bf16.gmra.mxu0 %v2264_v12 }
  0x92   : > { %795 = vmatmul.bf16.gmra.mxu2 %v2264_v12 }
  0x96   : > { %706 = vmatmul.bf16.gmra.mxu1 %v2264_v12 }
  0xa1   : > { %622 = vmatmul.bf16.gmra.mxu0 %v2265_v13 }
  0xa2   : > { %800 = vmatmul.bf16.gmra.mxu2 %v2265_v13 }
  0xa6   : > { %711 = vmatmul.bf16.gmra.mxu1 %v2265_v13 }
  0xb1   : > { %627 = vmatmul.bf16.gmra.mxu0 %v2266_v14 }
  0xb2   : > { %805 = vmatmul.bf16.gmra.mxu2 %v2266_v14 }
  0xb6   : > { %716 = vmatmul.bf16.gmra.mxu1 %v2266_v14 }
  0xc1   : > { %632 = vmatmul.bf16.gmra.mxu0 %v2267_v15 }
  0xc2   : > { %810 = vmatmul.bf16.gmra.mxu2 %v2267_v15 }
  0xc6   : > { %721 = vmatmul.bf16.gmra.mxu1 %v2267_v15 }
  0xce   : > { %v598_v17 = vpop.f32.mrf.mxu0 }
  0xd1   : > { %637 = vmatmul.bf16.gmra.mxu0 %v2268_v16 }
  0xd2   : > { %815 = vmatmul.bf16.gmra.mxu2 %v2268_v16 }
  0xd3   : > { %v687_v18 = vpop.f32.mrf.mxu1 }
  0xd4   : > { %v856_v19 = vpack.c.bf16 %v687_v18, %v598_v17 }
  0xd5   : > { %v776_v20 = vpop.f32.mrf.mxu2 }
  0xd6   : > { %v600_v21 = vpop.f32.mrf.mxu0  ;;  %v956_v22 = vrot.slane %v856_v19, 4  ;;  %726 = vmatmul.bf16.gmra.mxu1 %v2268_v16 }
  0xd8   : > { %964 = vst [vmem:[#allocation2 + $0x100] sm:$0xf] %v956_v22 }
  0xdb   : > { %v689_v23 = vpop.f32.mrf.mxu1 }
  0xdc   : > { %v858_v24 = vpack.c.bf16 %v689_v23, %v600_v21 }
  0xdd   : > { %v778_v25 = vpop.f32.mrf.mxu2 }
  0xde   : > { %v603_v27 = vpop.f32.mrf.mxu0  ;;  %v957_v28 = vrot.slane %v858_v24, 4  ;;  %v2273_v24 = vld [vmem:[%s2890_s5 + $0x68] sm:$0xff] }
  0xe0   : > { %965 = vst [vmem:[#allocation2 + $0x120] sm:$0xf] %v957_v28 }
  0xe1   : > { %642 = vmatmul.bf16.gmra.mxu0 %v2269_v26 }
  0xe2   : > { %820 = vmatmul.bf16.gmra.mxu2 %v2269_v26 }
  0xe3   : > { %v692_v29 = vpop.f32.mrf.mxu1 }
  0xe4   : > { %v860_v30 = vpack.c.bf16 %v692_v29, %v603_v27 }
  0xe5   : > { %v781_v31 = vpop.f32.mrf.mxu2 }
  0xe6   : > { %v605_v32 = vpop.f32.mrf.mxu0  ;;  %v958_v33 = vrot.slane %v860_v30, 4  ;;  %731 = vmatmul.bf16.gmra.mxu1 %v2269_v26  ;;  %v2128_v30 = vld [vmem:[#allocation2 + $0x100] sm:$0xf] }
  0xe8   : > { %966 = vst [vmem:[#allocation2 + $0x140] sm:$0xf] %v958_v33 }
  0xeb   : > { %v694_v34 = vpop.f32.mrf.mxu1 }
  0xec   : > { %v862_v35 = vpack.c.bf16 %v694_v34, %v605_v32 }
  0xed   : > { %v783_v36 = vpop.f32.mrf.mxu2 }
  0xee   : > { %v608_v38 = vpop.f32.mrf.mxu0  ;;  %v959_v39 = vrot.slane %v862_v35, 4 }
  0xef   : > { %v2370_v40 = vpack.c.bf16 %v608_v38, %v598_v17 }
  0xf0   : > { %967 = vst [vmem:[#allocation2 + $0x160] sm:$0xf] %v959_v39 }
  0xf1   : > { %2527 = vst [vmem:[#allocation2 + $0x80] sm:$0xff] %v2370_v40   ;;  %647 = vmatmul.bf16.gmra.mxu0 %v2270_v37 }
  0xf2   : > { %825 = vmatmul.bf16.gmra.mxu2 %v2270_v37 }
  0xf3   : > { %v697_v41 = vpop.f32.mrf.mxu1 }
  0xf4   : > { %v864_v42 = vpack.c.bf16 %v697_v41, %v608_v38 }
  0xf5   : > { %v786_v43 = vpop.f32.mrf.mxu2 }
  0xf6   : > { %v2450_v44 = vpack.c.bf16 %v786_v43, %v776_v20  ;;  %v610_v45 = vpop.f32.mrf.mxu0  ;;  %v972_v46 = vrot.slane %v864_v42, 4  ;;  %736 = vmatmul.bf16.gmra.mxu1 %v2270_v37  ;;  %v247_v42 = vld [vmem:[%s2890_s5 + $0x18] sm:$0xf]  ;;  %v1180_v43 = vld [vmem:[%s3181_s3] sm:$0xff] }
  0xf7   : > { %v2375_v47 = vpack.c.bf16 %v610_v45, %v600_v21  ;;  %v2346_v26 = vld [vmem:[#allocation2 + $0x15c] sm:$0xf0]  ;;  %251 = vst [vmem:[#allocation2 + $0x44] sm:$0xf] %v247_v42 }
  0xf8   : > { %2543 = vst [vmem:[#allocation2 + $0x180] sm:$0xff] %v2450_v44   ;;  %v248_v44 = vld [vmem:[%s2890_s5 + $0x1c] sm:$0xf] }
  0xf9   : > { %2528 = vst [vmem:[#allocation2 + $0xa0] sm:$0xff] %v2375_v47   ;;  %v2032_v47 = vld [vmem:[#allocation2 + $0x40] sm:$0xf] }
  0xfa   : > { %980 = vst [vmem:[#allocation2 + $0x104] sm:$0xf] %v972_v46  ;;  %v2064_v46 = vld [vmem:[#allocation2 + $0x80] sm:$0xf] }
  0xfb   : > { %v699_v48 = vpop.f32.mrf.mxu1  ;;  %252 = vst [vmem:[#allocation2 + $0x64] sm:$0xf] %v248_v44  ;;  %v2318_v44 = vld [vmem:[#allocation2 + $0x84] sm:$0xf] }
  0xfc   : > { %v866_v49 = vpack.c.bf16 %v699_v48, %v610_v45  ;;  %v2763_v45 = vmov 0   ;;  %v2314_v48 = vld [vmem:[#allocation2 + $0x5c] sm:$0xf0] }
  0xfd   : > { %v788_v50 = vpop.f32.mrf.mxu2  ;;  %2624 = vset.pattern.permute.xlu0 %v2763_v45  ;;  %2625 = vset.pattern.permute.xlu1 %v2763_v45 }
  0xfe   : > { %v2455_v52 = vpack.c.bf16 %v788_v50, %v778_v25  ;;  %v613_v53 = vpop.f32.mrf.mxu0  ;;  %v973_v54 = vrot.slane %v866_v49, 4  ;;  %v2160_v25 = vld [vmem:[#allocation2 + $0x140] sm:$0xf]  ;;  %1186 = vperm.xlu0 %2624, %v1180_v43   ;;  %v2310_v45 = vld [vmem:[#allocation2 + $0x44] sm:$0xf] }
  0xff   : > { %v2380_v55 = vpack.c.bf16 %v613_v53, %v603_v27  ;;  %v2192_v19 = vld [vmem:[#allocation2 + $0x180] sm:$0xf]  ;;  %v2161_v29 = vor.u32 %v2346_v26, %v2160_v25 }
 0x100   : > { %2544 = vst [vmem:[#allocation2 + $0x1a0] sm:$0xff] %v2455_v52   ;;  %v2322_v41 = vld [vmem:[#allocation2 + $0x9c] sm:$0xf0]  ;;  %v245_v52 = vld [vmem:[%s2890_s5 + $0x10] sm:$0xf] }
 0x101   : > { %2529 = vst [vmem:[#allocation2 + $0xc0] sm:$0xff] %v2380_v55   ;;  %652 = vmatmul.bf16.gmra.mxu0 %v2271_v51  ;;  %v2065_v50 = vor.u32 %v2322_v41, %v2064_v46  ;;  %v2274_v55 = vld [vmem:[%s2890_s5 + $0x70] sm:$0xff]  ;;  %v2334_v25 = vld [vmem:[#allocation2 + $0x104] sm:$0xf] }
 0x102   : > { %830 = vmatmul.bf16.gmra.mxu2 %v2271_v51  ;;  %981 = vst [vmem:[#allocation2 + $0x124] sm:$0xf] %v973_v54  ;;  %v2066_v41 = vld [vmem:[#allocation2 + $0xa0] sm:$0xf0] }
 0x103   : > { %v702_v56 = vpop.f32.mrf.mxu1  ;;  %249 = vst [vmem:[#allocation2 + $0x4] sm:$0xf] %v245_v52  ;;  %v2034_v46 = vld [vmem:[#allocation2 + $0x60] sm:$0xf0] }
 0x104   : > { %v868_v57 = vpack.c.bf16 %v702_v56, %v613_v53  ;;  %v246_v53 = vld [vmem:[%s2890_s5 + $0x14] sm:$0xf] }
 0x105   : > { %v791_v58 = vpop.f32.mrf.mxu2  ;;  %250 = vst [vmem:[#allocation2 + $0x24] sm:$0xf] %v246_v53  ;;  %v253_v53 = vld [vmem:[%s2890_s5 + $0x20] sm:$0xf] }
 0x106   : > { %v2460_v59 = vpack.c.bf16 %v791_v58, %v781_v31  ;;  %v615_v60 = vpop.f32.mrf.mxu0  ;;  %v974_v61 = vrot.slane %v868_v57, 4  ;;  %741 = vmatmul.bf16.gmra.mxu1 %v2271_v51  ;;  %v2338_v31 = vld [vmem:[#allocation2 + $0x11c] sm:$0xf0]  ;;  %v2033_v57 = vor.u32 %v2314_v48, %v2032_v47  ;;  %v255_v47 = vld [vmem:[%s2890_s5 + $0x28] sm:$0xf]  ;;  %v2069_v48 = vor.u32 %v2318_v44, %v2066_v41 }
 0x107   : > { %v2385_v62 = vpack.c.bf16 %v615_v60, %v605_v32  ;;  %v2354_v18 = vld [vmem:[#allocation2 + $0x19c] sm:$0xf0]  ;;  %v2129_v33 = vor.u32 %v2338_v31, %v2128_v30  ;;  %v1183_v30 = vld [vmem:[%s3181_s3 + $0x18] sm:$0xff]  ;;  %259 = vst [vmem:[#allocation2 + $0x48] sm:$0xf] %v255_v47 }
 0x108   : > { %2545 = vst [vmem:[#allocation2 + $0x1c0] sm:$0xff] %v2460_v59   ;;  %v2193_v21 = vor.u32 %v2354_v18, %v2192_v19  ;;  %v2096_v39 = vld [vmem:[#allocation2 + $0xc0] sm:$0xf] }
 0x109   : > { %2530 = vst [vmem:[#allocation2 + $0xe0] sm:$0xff] %v2385_v62   ;;  %v1181_v62 = vld [vmem:[%s3181_s3 + $0x8] sm:$0xff]  ;;  %v2130_v26 = vld [vmem:[#allocation2 + $0x120] sm:$0xf0] }
 0x10a   : > { %982 = vst [vmem:[#allocation2 + $0x144] sm:$0xf] %v974_v61  ;;  %v2306_v61 = vld [vmem:[#allocation2 + $0x1c] sm:$0xf0]  ;;  %1191 = vperm.xlu0 %2624, %v1181_v62   ;;  %v2133_v31 = vor.u32 %v2334_v25, %v2130_v26 }
 0x10b   : > { %v704_v1 = vpop.f32.mrf.mxu1  ;;  %257 = vst [vmem:[#allocation2 + $0x8] sm:$0xf] %v253_v53 }
 0x10c   : > { %v870_v4 = vpack.c.bf16 %v704_v1, %v615_v60  ;;  %v2000_v60 = vld [vmem:[#allocation2] sm:$0xf]  ;;  %v2002_v52 = vld [vmem:[#allocation2 + $0x20] sm:$0xf0] }
 0x10d   : > { %v793_v5 = vpop.f32.mrf.mxu2  ;;  %v2001_v63 = vor.u32 %v2306_v61, %v2000_v60 }
 0x10e   : > { %v2465_v7 = vpack.c.bf16 %v793_v5, %v783_v36  ;;  %v2917_v8 = vpop.f32.mrf.mxu0  ;;  %v975_v9 = vrot.slane %v870_v4, 4 }
 0x10f   : > { %v2224_v15 = vld [vmem:[#allocation2 + $0x1c0] sm:$0xf]  ;;  %v2358_v2 = vld [vmem:[#allocation2 + $0x1c4] sm:$0xf] }
 0x110   : > { %2546 = vst [vmem:[#allocation2 + $0x1e0] sm:$0xff] %v2465_v7   ;;  %v2330_v36 = vld [vmem:[#allocation2 + $0xdc] sm:$0xf0] }
 0x111   : > { %657 = vmatmul.bf16.gmra.mxu0 %v2272_v6  ;;  %983 = vst [vmem:[#allocation2 + $0x164] sm:$0xf] %v975_v9  ;;  %v2097_v40 = vor.u32 %v2330_v36, %v2096_v39  ;;  %v2194_v9 = vld [vmem:[#allocation2 + $0x1a0] sm:$0xf0] }
 0x112   : > { %835 = vmatmul.bf16.gmra.mxu2 %v2272_v6 }
 0x113   : > { %v707_v10 = vpop.f32.mrf.mxu1 }
 0x114   : > { %v872_v11 = vpack.c.bf16 %v707_v10, %v2917_v8 }
 0x115   : > { %v2920_v12 = vpop.f32.mrf.mxu2 }
 0x116   : > { %v2922_v13 = vpop.f32.mrf.mxu0  ;;  %v988_v14 = vrot.slane %v872_v11, 4  ;;  %746 = vmatmul.bf16.gmra.mxu1 %v2272_v6  ;;  %v2953_v6 = vld [vmem:[%s3180_s2] sm:$0xff] }
 0x117   : > { %v2362_v16 = vld [vmem:[#allocation2 + $0x1dc] sm:$0xf0]  ;;  %v2226_v0 = vld [vmem:[#allocation2 + $0x1e0] sm:$0xf0] }
 0x118   : > { %v2225_v17 = vor.u32 %v2362_v16, %v2224_v15  ;;  %996 = vst [vmem:[#allocation2 + $0x108] sm:$0xf] %v988_v14  ;;  %v2229_v5 = vor.u32 %v2358_v2, %v2226_v0  ;;  %v2350_v14 = vld [vmem:[#allocation2 + $0x184] sm:$0xf]  ;;  %v1182_v16 = vld [vmem:[%s3181_s3 + $0x10] sm:$0xff] }
 0x119   : > { %v2197_v15 = vor.u32 %v2350_v14, %v2194_v9  ;;  %1196 = vperm.xlu1 %2625, %v1182_v16  }
 0x11a   : > { %1536 = vmatpush.bf16.msra.mxu3 %v2225_v17  ;;  %v2162_v17 = vld [vmem:[#allocation2 + $0x160] sm:$0xf0] }
 0x11b   : > { %v709_v20 = vpop.f32.mrf.mxu1 }
 0x11c   : > { %v874_v22 = vpack.c.bf16 %v709_v20, %v2922_v13 }
 0x11d   : > { %v2925_v23 = vpop.f32.mrf.mxu2 }
 0x11e   : > { %1537 = vmatpush.bf16.msra.mxu3 %v2193_v21  ;;  %v2928_v27 = vpop.f32.mrf.mxu0  ;;  %v989_v28 = vrot.slane %v874_v22, 4  ;;  %v2275_v21 = vld [vmem:[%s2890_s5 + $0x78] sm:$0xff] }
 0x120   : > { %997 = vst [vmem:[#allocation2 + $0x128] sm:$0xf] %v989_v28 }
 0x121   : > { %662 = vmatmul.bf16.gmra.mxu0 %v2273_v24  ;;  %1201 = vperm.xlu1 %2625, %v1183_v30   ;;  %v264_v30 = vld [vmem:[%s2890_s5 + $0x3c] sm:$0xf] }
 0x122   : > { %840 = vmatmul.bf16.gmra.mxu2 %v2273_v24  ;;  %1538 = vmatpush.bf16.msra.mxu3 %v2161_v29  ;;  %268 = vst [vmem:[#allocation2 + $0x6c] sm:$0xf] %v264_v30  ;;  %v272_v30 = vld [vmem:[%s2890_s5 + $0x4c] sm:$0xf] }
 0x123   : > { %v712_v32 = vpop.f32.mrf.mxu1  ;;  %276 = vst [vmem:[#allocation2 + $0x70] sm:$0xf] %v272_v30 }
 0x124   : > { %v876_v34 = vpack.c.bf16 %v712_v32, %v2928_v27  ;;  %v2098_v32 = vld [vmem:[#allocation2 + $0xe0] sm:$0xf0] }
 0x125   : > { %v2931_v35 = vpop.f32.mrf.mxu2 }
 0x126   : > { %1539 = vmatpush.bf16.msra.mxu3 %v2129_v33  ;;  %v2933_v37 = vpop.f32.mrf.mxu0  ;;  %v990_v38 = vrot.slane %v876_v34, 4  ;;  %751 = vmatmul.bf16.gmra.mxu1 %v2273_v24  ;;  %v2326_v33 = vld [vmem:[#allocation2 + $0xc4] sm:$0xf] }
 0x128   : > { %998 = vst [vmem:[#allocation2 + $0x148] sm:$0xf] %v990_v38  ;;  %v2970_v38 = vld [vmem:[%s3180_s2 + $0x8] sm:$0xff] }
 0x12a   : > { %1540 = vmatpush.bf16.msra.mxu3 %v2097_v40 }
 0x12b   : > { %v714_v49 = vpop.f32.mrf.mxu1 }
 0x12c   : > { %v878_v51 = vpack.c.bf16 %v714_v49, %v2933_v37  ;;  %v256_v49 = vld [vmem:[%s2890_s5 + $0x2c] sm:$0xf] }
 0x12d   : > { %v2943_v54 = vpop.f32.mrf.mxu2  ;;  %260 = vst [vmem:[#allocation2 + $0x68] sm:$0xf] %v256_v49 }
 0x12e   : > { %1541 = vmatpush.bf16.msra.mxu3 %v2065_v50  ;;  %v628_v56 = vpop.f32.mrf.mxu0  ;;  %v991_v58 = vrot.slane %v878_v51, 4  ;;  %v2302_v51 = vld [vmem:[#allocation2 + $0x4] sm:$0xf] }
 0x12f   : > { %v2390_v59 = vpack.c.bf16 %v628_v56, %v2917_v8  ;;  %v2005_v60 = vor.u32 %v2302_v51, %v2002_v52 }
 0x130   : > { %999 = vst [vmem:[#allocation2 + $0x168] sm:$0xf] %v991_v58 }
 0x131   : > { %2531 = vst [vmem:[#allocation2 + $0x88] sm:$0xff] %v2390_v59   ;;  %667 = vmatmul.bf16.gmra.mxu0 %v2274_v55 }
 0x132   : > { %845 = vmatmul.bf16.gmra.mxu2 %v2274_v55  ;;  %1542 = vmatpush.bf16.msra.mxu3 %v2033_v57 }
 0x133   : > { %v717_v1 = vpop.f32.mrf.mxu1 }
 0x134   : > { %v880_v3 = vpack.c.bf16 %v717_v1, %v628_v56 }
 0x135   : > { %v806_v4 = vpop.f32.mrf.mxu2 }
 0x136   : > { %v2470_v7 = vpack.c.bf16 %v806_v4, %v2920_v12  ;;  %1543 = vmatpush.bf16.msra.mxu3 %v2001_v63  ;;  %v630_v8 = vpop.f32.mrf.mxu0  ;;  %v1004_v10 = vrot.slane %v880_v3, 4  ;;  %756 = vmatmul.bf16.gmra.mxu1 %v2274_v55  ;;  %v2342_v12 = vld [vmem:[#allocation2 + $0x144] sm:$0xf] }
 0x137   : > { %v2395_v11 = vpack.c.bf16 %v630_v8, %v2922_v13  ;;  %v2165_v20 = vor.u32 %v2342_v12, %v2162_v17  ;;  %v254_v55 = vld [vmem:[%s2890_s5 + $0x24] sm:$0xf]  ;;  %v2347_v14 = vld [vmem:[#allocation2 + $0x164] sm:$0xf0] }
 0x138   : > { %2547 = vst [vmem:[#allocation2 + $0x188] sm:$0xff] %v2470_v7   ;;  %v2136_v17 = vld [vmem:[#allocation2 + $0x108] sm:$0xf] }
 0x139   : > { %2532 = vst [vmem:[#allocation2 + $0xa8] sm:$0xff] %v2395_v11   ;;  %1544 = vmatmul.bf16.vlgmr.msra.gmra.mxu3 %v2953_v6  ;;  %v2168_v11 = vld [vmem:[#allocation2 + $0x148] sm:$0xf] }
 0x13a   : > { %1555 = vmatpush.bf16.msrb.mxu3 %v2229_v5  ;;  %1012 = vst [vmem:[#allocation2 + $0x10c] sm:$0xf] %v1004_v10  ;;  %v2169_v12 = vor.u32 %v2347_v14, %v2168_v11 }
 0x13b   : > { %v719_v18 = vpop.f32.mrf.mxu1  ;;  %258 = vst [vmem:[#allocation2 + $0x28] sm:$0xf] %v254_v55 }
 0x13c   : > { %v882_v19 = vpack.c.bf16 %v719_v18, %v630_v8  ;;  %v2339_v18 = vld [vmem:[#allocation2 + $0x124] sm:$0xf0] }
 0x13d   : > { %v808_v13 = vpop.f32.mrf.mxu2 }
 0x13e   : > { %1556 = vmatpush.bf16.msrb.mxu3 %v2197_v15  ;;  %v2475_v22 = vpack.c.bf16 %v808_v13, %v2925_v23  ;;  %v633_v24 = vpop.f32.mrf.mxu0  ;;  %v1005_v28 = vrot.slane %v882_v19, 4  ;;  %v2137_v13 = vor.u32 %v2339_v18, %v2136_v17 }
 0x13f   : > { %v2400_v29 = vpack.c.bf16 %v633_v24, %v2928_v27  ;;  %v2101_v27 = vor.u32 %v2326_v33, %v2098_v32  ;;  %v2200_v5 = vld [vmem:[#allocation2 + $0x188] sm:$0xf] }
 0x140   : > { %2548 = vst [vmem:[#allocation2 + $0x1a8] sm:$0xff] %v2475_v22   ;;  %v2072_v32 = vld [vmem:[#allocation2 + $0x88] sm:$0xf] }
 0x141   : > { %2533 = vst [vmem:[#allocation2 + $0xc8] sm:$0xff] %v2400_v29   ;;  %672 = vmatmul.bf16.gmra.mxu0 %v2275_v21  ;;  %v263_v29 = vld [vmem:[%s2890_s5 + $0x38] sm:$0xf]  ;;  %v2315_v33 = vld [vmem:[#allocation2 + $0x64] sm:$0xf0] }
 0x142   : > { %1557 = vmatpush.bf16.msrb.mxu3 %v2165_v20  ;;  %850 = vmatmul.bf16.gmra.mxu2 %v2275_v21  ;;  %1013 = vst [vmem:[#allocation2 + $0x12c] sm:$0xf] %v1005_v28  ;;  %v2307_v47 = vld [vmem:[#allocation2 + $0x24] sm:$0xf0] }
 0x143   : > { %v722_v23 = vpop.f32.mrf.mxu1  ;;  %267 = vst [vmem:[#allocation2 + $0x4c] sm:$0xf] %v263_v29 }
 0x144   : > { %v884_v34 = vpack.c.bf16 %v722_v23, %v633_v24  ;;  %v2040_v23 = vld [vmem:[#allocation2 + $0x48] sm:$0xf] }
 0x145   : > { %v811_v36 = vpop.f32.mrf.mxu2 }
 0x146   : > { %1558 = vmatpush.bf16.msrb.mxu3 %v2133_v31  ;;  %v2480_v39 = vpack.c.bf16 %v811_v36, %v2931_v35  ;;  %v635_v40 = vpop.f32.mrf.mxu0  ;;  %v1006_v42 = vrot.slane %v884_v34, 4  ;;  %761 = vmatmul.bf16.gmra.mxu1 %v2275_v21  ;;  %v2037_v35 = vor.u32 %v2310_v45, %v2034_v46  ;;  %v2323_v31 = vld [vmem:[#allocation2 + $0xa4] sm:$0xf0] }
 0x147   : > { %v2405_v43 = vpack.c.bf16 %v635_v40, %v2933_v37  ;;  %v2355_v4 = vld [vmem:[#allocation2 + $0x1a4] sm:$0xf0]  ;;  %v2073_v36 = vor.u32 %v2323_v31, %v2072_v32 }
 0x148   : > { %2549 = vst [vmem:[#allocation2 + $0x1c8] sm:$0xff] %v2480_v39   ;;  %v2201_v8 = vor.u32 %v2355_v4, %v2200_v5  ;;  %v2104_v26 = vld [vmem:[#allocation2 + $0xc8] sm:$0xf]  ;;  %v261_v39 = vld [vmem:[%s2890_s5 + $0x30] sm:$0xf] }
 0x149   : > { %2534 = vst [vmem:[#allocation2 + $0xe8] sm:$0xff] %v2405_v43   ;;  %1549 = vmatmul.bf16.gmra.mxu3 %v2970_v38  ;;  %v2041_v43 = vor.u32 %v2315_v33, %v2040_v23  ;;  %v2008_v46 = vld [vmem:[#allocation2 + $0x8] sm:$0xf]  ;;  %v2335_v5 = vld [vmem:[#allocation2 + $0x10c] sm:$0xf] }
 0x14a   : > { %1559 = vmatpush.bf16.msrb.mxu3 %v2101_v27  ;;  %1014 = vst [vmem:[#allocation2 + $0x14c] sm:$0xf] %v1006_v42  ;;  %v269_v33 = vld [vmem:[%s2890_s5 + $0x40] sm:$0xf] }
 0x14b   : > { %v724_v50 = vpop.f32.mrf.mxu1  ;;  %265 = vst [vmem:[#allocation2 + $0xc] sm:$0xf] %v261_v39 }
 0x14c   : > { %v886_v37 = vpack.c.bf16 %v724_v50, %v635_v40  ;;  %v262_v40 = vld [vmem:[%s2890_s5 + $0x34] sm:$0xf]  ;;  %273 = vst [vmem:[#allocation2 + $0x10] sm:$0xf] %v269_v33 }
 0x14d   : > { %v813_v56 = vpop.f32.mrf.mxu2  ;;  %266 = vst [vmem:[#allocation2 + $0x2c] sm:$0xf] %v262_v40 }
 0x14e   : > { %1560 = vmatpush.bf16.msrb.mxu3 %v2069_v48  ;;  %v2485_v57 = vpack.c.bf16 %v813_v56, %v2943_v54  ;;  %v2980_v58 = vpop.f32.mrf.mxu0  ;;  %v1007_v59 = vrot.slane %v886_v37, 4  ;;  %v2009_v48 = vor.u32 %v2307_v47, %v2008_v46  ;;  %v2202_v56 = vld [vmem:[#allocation2 + $0x1a8] sm:$0xf0] }
 0x14f   : > { %v2232_v2 = vld [vmem:[#allocation2 + $0x1c8] sm:$0xf]  ;;  %v2359_v50 = vld [vmem:[#allocation2 + $0x1cc] sm:$0xf] }
 0x150   : > { %2550 = vst [vmem:[#allocation2 + $0x1e8] sm:$0xff] %v2485_v57   ;;  %v2331_v22 = vld [vmem:[#allocation2 + $0xe4] sm:$0xf0]  ;;  %v2106_v11 = vld [vmem:[#allocation2 + $0xe8] sm:$0xf0] }
 0x151   : > { %1015 = vst [vmem:[#allocation2 + $0x16c] sm:$0xf] %v1007_v59  ;;  %v2105_v28 = vor.u32 %v2331_v22, %v2104_v26  ;;  %v2351_v59 = vld [vmem:[#allocation2 + $0x18c] sm:$0xf] }
 0x152   : > { %1561 = vmatpush.bf16.msrb.mxu3 %v2037_v35  ;;  %v2319_v22 = vld [vmem:[#allocation2 + $0x8c] sm:$0xf] }
 0x153   : > { %v727_v61 = vpop.f32.mrf.mxu1  ;;  %v2042_v26 = vld [vmem:[#allocation2 + $0x68] sm:$0xf0] }
 0x154   : > { %v888_v62 = vpack.c.bf16 %v727_v61, %v2980_v58  ;;  %v2343_v61 = vld [vmem:[#allocation2 + $0x14c] sm:$0xf] }
 0x155   : > { %v2983_v63 = vpop.f32.mrf.mxu2  ;;  %v2303_v32 = vld [vmem:[#allocation2 + $0xc] sm:$0xf] }
 0x156   : > { %1562 = vmatpush.bf16.msrb.mxu3 %v2005_v60  ;;  %v2985_v0 = vpop.f32.mrf.mxu0  ;;  %v1020_v1 = vrot.slane %v888_v62, 4  ;;  %v2205_v60 = vor.u32 %v2351_v59, %v2202_v56  ;;  %v2010_v23 = vld [vmem:[#allocation2 + $0x28] sm:$0xf0] }
 0x157   : > { %v2363_v3 = vld [vmem:[#allocation2 + $0x1e4] sm:$0xf0]  ;;  %v2234_v49 = vld [vmem:[#allocation2 + $0x1e8] sm:$0xf0] }
 0x158   : > { %v2233_v54 = vor.u32 %v2363_v3, %v2232_v2  ;;  %1028 = vst [vmem:[#allocation2 + $0x110] sm:$0xf] %v1020_v1  ;;  %v2237_v37 = vor.u32 %v2359_v50, %v2234_v49  ;;  %v2170_v62 = vld [vmem:[#allocation2 + $0x168] sm:$0xf0] }
 0x159   : > { %1563 = vmatmul.bf16.vlgmr.msrb.gmra.mxu3 %v2953_v6  ;;  %v2173_v3 = vor.u32 %v2343_v61, %v2170_v62 }
 0x15a   : > { %1574 = vmatpush.bf16.msra.mxu3 %v2233_v54 }
 0x15b   : > { %v729_v7 = vpop.f32.mrf.mxu1 }
 0x15c   : > { %v890_v9 = vpack.c.bf16 %v729_v7, %v2985_v0 }
 0x15d   : > { %v2989_v10 = vpop.f32.mrf.mxu2 }
 0x15e   : > { %1575 = vmatpush.bf16.msra.mxu3 %v2201_v8  ;;  %v2991_v15 = vpop.f32.mrf.mxu0  ;;  %v1021_v16 = vrot.slane %v890_v9, 4 }
 0x160   : > { %1029 = vst [vmem:[#allocation2 + $0x130] sm:$0xf] %v1021_v16  ;;  %v2327_v16 = vld [vmem:[#allocation2 + $0xcc] sm:$0xf] }
 0x162   : > { %1576 = vmatpush.bf16.msra.mxu3 %v2169_v12 }
 0x163   : > { %v732_v19 = vpop.f32.mrf.mxu1 }
 0x164   : > { %v892_v20 = vpack.c.bf16 %v732_v19, %v2991_v15 }
 0x165   : > { %v2994_v21 = vpop.f32.mrf.mxu2 }
 0x166   : > { %1577 = vmatpush.bf16.msra.mxu3 %v2137_v13  ;;  %v2996_v24 = vpop.f32.mrf.mxu0  ;;  %v1022_v25 = vrot.slane %v892_v20, 4  ;;  %v2074_v13 = vld [vmem:[#allocation2 + $0xa8] sm:$0xf0] }
 0x167   : > { %v2077_v29 = vor.u32 %v2319_v22, %v2074_v13  ;;  %v2340_v61 = vld [vmem:[#allocation2 + $0x12c] sm:$0xf0] }
 0x168   : > { %1030 = vst [vmem:[#allocation2 + $0x150] sm:$0xf] %v1022_v25  ;;  %v2311_v25 = vld [vmem:[#allocation2 + $0x4c] sm:$0xf] }
 0x169   : > { %1568 = vmatmul.bf16.gmra.mxu3 %v2970_v38 }
 0x16a   : > { %1578 = vmatpush.bf16.msra.mxu3 %v2105_v28  ;;  %v271_v28 = vld [vmem:[%s2890_s5 + $0x48] sm:$0xf] }
 0x16b   : > { %v734_v34 = vpop.f32.mrf.mxu1  ;;  %275 = vst [vmem:[#allocation2 + $0x50] sm:$0xf] %v271_v28 }
 0x16c   : > { %v894_v27 = vpack.c.bf16 %v734_v34, %v2996_v24  ;;  %v270_v34 = vld [vmem:[%s2890_s5 + $0x44] sm:$0xf] }
 0x16d   : > { %v3004_v41 = vpop.f32.mrf.mxu2  ;;  %274 = vst [vmem:[#allocation2 + $0x30] sm:$0xf] %v270_v34 }
 0x16e   : > { %1579 = vmatpush.bf16.msra.mxu3 %v2073_v36  ;;  %v648_v42 = vpop.f32.mrf.mxu0  ;;  %v1023_v44 = vrot.slane %v894_v27, 4 }
 0x16f   : > { %v2410_v45 = vpack.c.bf16 %v648_v42, %v2980_v58 }
 0x170   : > { %1031 = vst [vmem:[#allocation2 + $0x170] sm:$0xf] %v1023_v44 }
 0x171   : > { %2535 = vst [vmem:[#allocation2 + $0x90] sm:$0xff] %v2410_v45  }
 0x172   : > { %1580 = vmatpush.bf16.msra.mxu3 %v2041_v43 }
 0x173   : > { %v737_v35 = vpop.f32.mrf.mxu1 }
 0x174   : > { %v896_v51 = vpack.c.bf16 %v737_v35, %v648_v42  ;;  %v2013_v42 = vor.u32 %v2303_v32, %v2010_v23  ;;  %v2308_v28 = vld [vmem:[#allocation2 + $0x2c] sm:$0xf0] }
 0x175   : > { %v826_v52 = vpop.f32.mrf.mxu2 }
 0x176   : > { %v2490_v53 = vpack.c.bf16 %v826_v52, %v2983_v63  ;;  %1581 = vmatpush.bf16.msra.mxu3 %v2009_v48  ;;  %v650_v55 = vpop.f32.mrf.mxu0  ;;  %v1036_v57 = vrot.slane %v896_v51, 4 }
 0x177   : > { %v2415_v58 = vpack.c.bf16 %v650_v55, %v2985_v0  ;;  %v2138_v0 = vld [vmem:[#allocation2 + $0x128] sm:$0xf0]  ;;  %v2348_v56 = vld [vmem:[#allocation2 + $0x16c] sm:$0xf0] }
 0x178   : > { %2551 = vst [vmem:[#allocation2 + $0x190] sm:$0xff] %v2490_v53   ;;  %v2141_v9 = vor.u32 %v2335_v5, %v2138_v0 }
 0x179   : > { %2536 = vst [vmem:[#allocation2 + $0xb0] sm:$0xff] %v2415_v58   ;;  %1582 = vmatmul.bf16.vlgmr.msra.gmra.mxu3 %v2953_v6 }
 0x17a   : > { %1593 = vmatpush.bf16.msrb.mxu3 %v2237_v37  ;;  %1044 = vst [vmem:[#allocation2 + $0x114] sm:$0xf] %v1036_v57 }
 0x17b   : > { %v739_v1 = vpop.f32.mrf.mxu1 }
 0x17c   : > { %v898_v2 = vpack.c.bf16 %v739_v1, %v650_v55  ;;  %v2176_v55 = vld [vmem:[#allocation2 + $0x150] sm:$0xf] }
 0x17d   : > { %v828_v63 = vpop.f32.mrf.mxu2  ;;  %v2177_v59 = vor.u32 %v2348_v56, %v2176_v55 }
 0x17e   : > { %1594 = vmatpush.bf16.msrb.mxu3 %v2205_v60  ;;  %v2495_v54 = vpack.c.bf16 %v828_v63, %v2989_v10  ;;  %v653_v4 = vpop.f32.mrf.mxu0  ;;  %v1037_v7 = vrot.slane %v898_v2, 4  ;;  %v2109_v10 = vor.u32 %v2327_v16, %v2106_v11  ;;  %v2144_v60 = vld [vmem:[#allocation2 + $0x110] sm:$0xf] }
 0x17f   : > { %v2420_v8 = vpack.c.bf16 %v653_v4, %v2991_v15  ;;  %v2208_v50 = vld [vmem:[#allocation2 + $0x190] sm:$0xf]  ;;  %v2145_v1 = vor.u32 %v2340_v61, %v2144_v60 }
 0x180   : > { %2552 = vst [vmem:[#allocation2 + $0x1b0] sm:$0xff] %v2495_v54   ;;  %v2080_v11 = vld [vmem:[#allocation2 + $0x90] sm:$0xf] }
 0x181   : > { %2537 = vst [vmem:[#allocation2 + $0xd0] sm:$0xff] %v2420_v8   ;;  %v280_v8 = vld [vmem:[%s2890_s5 + $0x5c] sm:$0xf]  ;;  %v2316_v16 = vld [vmem:[#allocation2 + $0x6c] sm:$0xf0] }
 0x182   : > { %1595 = vmatpush.bf16.msrb.mxu3 %v2173_v3  ;;  %1045 = vst [vmem:[#allocation2 + $0x134] sm:$0xf] %v1037_v7  ;;  %v279_v7 = vld [vmem:[%s2890_s5 + $0x58] sm:$0xf] }
 0x183   : > { %v742_v14 = vpop.f32.mrf.mxu1  ;;  %283 = vst [vmem:[#allocation2 + $0x54] sm:$0xf] %v279_v7 }
 0x184   : > { %v900_v12 = vpack.c.bf16 %v742_v14, %v653_v4  ;;  %284 = vst [vmem:[#allocation2 + $0x74] sm:$0xf] %v280_v8  ;;  %v2048_v14 = vld [vmem:[#allocation2 + $0x50] sm:$0xf] }
 0x185   : > { %v831_v17 = vpop.f32.mrf.mxu2 }
 0x186   : > { %1596 = vmatpush.bf16.msrb.mxu3 %v2141_v9  ;;  %v2500_v18 = vpack.c.bf16 %v831_v17, %v2994_v21  ;;  %v655_v19 = vpop.f32.mrf.mxu0  ;;  %v1038_v20 = vrot.slane %v900_v12, 4  ;;  %v2045_v21 = vor.u32 %v2311_v25, %v2042_v26  ;;  %v2324_v9 = vld [vmem:[#allocation2 + $0xac] sm:$0xf0] }
 0x187   : > { %v2425_v15 = vpack.c.bf16 %v655_v19, %v2996_v24  ;;  %v2356_v35 = vld [vmem:[#allocation2 + $0x1ac] sm:$0xf0]  ;;  %v2081_v17 = vor.u32 %v2324_v9, %v2080_v11  ;;  %v2320_v9 = vld [vmem:[#allocation2 + $0x94] sm:$0xf] }
 0x188   : > { %2553 = vst [vmem:[#allocation2 + $0x1d0] sm:$0xff] %v2500_v18   ;;  %v2209_v52 = vor.u32 %v2356_v35, %v2208_v50  ;;  %v2112_v5 = vld [vmem:[#allocation2 + $0xd0] sm:$0xf] }
 0x189   : > { %2538 = vst [vmem:[#allocation2 + $0xf0] sm:$0xff] %v2425_v15   ;;  %1587 = vmatmul.bf16.gmra.mxu3 %v2970_v38  ;;  %v277_v18 = vld [vmem:[%s2890_s5 + $0x50] sm:$0xf]  ;;  %v2049_v15 = vor.u32 %v2316_v16, %v2048_v14 }
 0x18a   : > { %1597 = vmatpush.bf16.msrb.mxu3 %v2109_v10  ;;  %1046 = vst [vmem:[#allocation2 + $0x154] sm:$0xf] %v1038_v20  ;;  %v2016_v26 = vld [vmem:[#allocation2 + $0x10] sm:$0xf]  ;;  %v2312_v11 = vld [vmem:[#allocation2 + $0x54] sm:$0xf] }
 0x18b   : > { %v744_v31 = vpop.f32.mrf.mxu1  ;;  %281 = vst [vmem:[#allocation2 + $0x14] sm:$0xf] %v277_v18  ;;  %v3065_v14 = vpop.permute.xlu1 %1196  ;;  %v2050_v16 = vld [vmem:[#allocation2 + $0x70] sm:$0xf0] }
 0x18c   : > { %v902_v24 = vpack.c.bf16 %v744_v31, %v655_v19  ;;  %v278_v19 = vld [vmem:[%s2890_s5 + $0x54] sm:$0xf] }
 0x18d   : > { %v833_v36 = vpop.f32.mrf.mxu2  ;;  %282 = vst [vmem:[#allocation2 + $0x34] sm:$0xf] %v278_v19 }
 0x18e   : > { %1598 = vmatpush.bf16.msrb.mxu3 %v2077_v29  ;;  %v2505_v27 = vpack.c.bf16 %v833_v36, %v3004_v41  ;;  %v3020_v39 = vpop.f32.mrf.mxu0  ;;  %v1039_v40 = vrot.slane %v902_v24, 4  ;;  %v2017_v29 = vor.u32 %v2308_v28, %v2016_v26  ;;  %v2210_v36 = vld [vmem:[#allocation2 + $0x1b0] sm:$0xf0] }
 0x18f   : > { %v2240_v48 = vld [vmem:[#allocation2 + $0x1d0] sm:$0xf]  ;;  %v2360_v31 = vld [vmem:[#allocation2 + $0x1d4] sm:$0xf] }
 0x190   : > { %2554 = vst [vmem:[#allocation2 + $0x1f0] sm:$0xff] %v2505_v27   ;;  %v2332_v3 = vld [vmem:[#allocation2 + $0xec] sm:$0xf0]  ;;  %v2114_v60 = vld [vmem:[#allocation2 + $0xf0] sm:$0xf0] }
 0x191   : > { %1047 = vst [vmem:[#allocation2 + $0x174] sm:$0xf] %v1039_v40  ;;  %v2113_v0 = vor.u32 %v2332_v3, %v2112_v5  ;;  %v2352_v40 = vld [vmem:[#allocation2 + $0x194] sm:$0xf] }
 0x192   : > { %1599 = vmatpush.bf16.msrb.mxu3 %v2045_v21  ;;  %v2304_v18 = vld [vmem:[#allocation2 + $0x14] sm:$0xf] }
 0x193   : > { %v747_v43 = vpop.f32.mrf.mxu1 }
 0x194   : > { %v904_v44 = vpack.c.bf16 %v747_v43, %v3020_v39  ;;  %v2213_v43 = vor.u32 %v2352_v40, %v2210_v36  ;;  %v2018_v19 = vld [vmem:[#allocation2 + $0x30] sm:$0xf0] }
 0x195   : > { %v3023_v45 = vpop.f32.mrf.mxu2 }
 0x196   : > { %1600 = vmatpush.bf16.msrb.mxu3 %v2013_v42  ;;  %v3025_v46 = vpop.f32.mrf.mxu0  ;;  %v1052_v47 = vrot.slane %v904_v44, 4  ;;  %v3049_v42 = vpop.permute.xlu0 %1186  ;;  %v2344_v44 = vld [vmem:[#allocation2 + $0x154] sm:$0xf] }
 0x197   : > { %v2364_v49 = vld [vmem:[#allocation2 + $0x1ec] sm:$0xf0]  ;;  %v2242_v30 = vld [vmem:[#allocation2 + $0x1f0] sm:$0xf0] }
 0x198   : > { %v2241_v41 = vor.u32 %v2364_v49, %v2240_v48  ;;  %1060 = vst [vmem:[#allocation2 + $0x118] sm:$0xf] %v1052_v47  ;;  %v2245_v24 = vor.u32 %v2360_v31, %v2242_v30  ;;  %v2178_v47 = vld [vmem:[#allocation2 + $0x170] sm:$0xf0]  ;;  %v3075_v31 = vpop.permute.xlu1 %1201 }
 0x199   : > { %1601 = vmatmul.bf16.vlgmr.msrb.gmra.mxu3 %v2953_v6  ;;  %v2181_v35 = vor.u32 %v2344_v44, %v2178_v47 }
 0x19a   : > { %1612 = vmatpush.bf16.msra.mxu3 %v2241_v41 }
 0x19b   : > { %v749_v51 = vpop.f32.mrf.mxu1 }
 0x19c   : > { %v906_v37 = vpack.c.bf16 %v749_v51, %v3025_v46 }
 0x19d   : > { %v3029_v53 = vpop.f32.mrf.mxu2 }
 0x19e   : > { %1613 = vmatpush.bf16.msra.mxu3 %v2209_v52  ;;  %v3031_v57 = vpop.f32.mrf.mxu0  ;;  %v1053_v58 = vrot.slane %v906_v37, 4  ;;  %v2336_v52 = vld [vmem:[#allocation2 + $0x114] sm:$0xf] }
 0x19f   : > { %v2146_v37 = vld [vmem:[#allocation2 + $0x130] sm:$0xf0] }
 0x1a0   : > { %1061 = vst [vmem:[#allocation2 + $0x138] sm:$0xf] %v1053_v58  ;;  %v2149_v58 = vor.u32 %v2336_v52, %v2146_v37  ;;  %v295_v52 = vld [vmem:[%s2890_s5 + $0x78] sm:$0xf]  ;;  %v296_v37 = vld [vmem:[%s2890_s5 + $0x7c] sm:$0xf] }
 0x1a1   : > { %299 = vst [vmem:[#allocation2 + $0x5c] sm:$0xf] %v295_v52 }
 0x1a2   : > { %1614 = vmatpush.bf16.msra.mxu3 %v2177_v59  ;;  %v3059_v59 = vpop.permute.xlu0 %1191  ;;  %300 = vst [vmem:[#allocation2 + $0x7c] sm:$0xf] %v296_v37 }
 0x1a3   : > { %v752_v62 = vpop.f32.mrf.mxu1 }
 0x1a4   : > { %v908_v2 = vpack.c.bf16 %v752_v62, %v3031_v57  ;;  %v2328_v62 = vld [vmem:[#allocation2 + $0xd4] sm:$0xf] }
 0x1a5   : > { %v3034_v63 = vpop.f32.mrf.mxu2 }
 0x1a6   : > { %1615 = vmatpush.bf16.msra.mxu3 %v2145_v1  ;;  %v3036_v54 = vpop.f32.mrf.mxu0  ;;  %v1054_v4 = vrot.slane %v908_v2, 4 }
 0x1a8   : > { %1062 = vst [vmem:[#allocation2 + $0x158] sm:$0xf] %v1054_v4  ;;  %v2117_v4 = vor.u32 %v2328_v62, %v2114_v60  ;;  %v293_v62 = vld [vmem:[%s2890_s5 + $0x70] sm:$0xf] }
 0x1a9   : > { %1606 = vmatmul.bf16.gmra.mxu3 %v2970_v38  ;;  %297 = vst [vmem:[#allocation2 + $0x1c] sm:$0xf] %v293_v62 }
 0x1aa   : > { %1616 = vmatpush.bf16.msra.mxu3 %v2113_v0  ;;  %v2082_v0 = vld [vmem:[#allocation2 + $0xb0] sm:$0xf0] }
 0x1ab   : > { %v754_v12 = vpop.f32.mrf.mxu1 }
 0x1ac   : > { %v910_v10 = vpack.c.bf16 %v754_v12, %v3036_v54  ;;  %v287_v12 = vld [vmem:[%s2890_s5 + $0x68] sm:$0xf] }
 0x1ad   : > { %v3044_v13 = vpop.f32.mrf.mxu2  ;;  %291 = vst [vmem:[#allocation2 + $0x58] sm:$0xf] %v287_v12 }
 0x1ae   : > { %1617 = vmatpush.bf16.msra.mxu3 %v2081_v17  ;;  %v668_v20 = vpop.f32.mrf.mxu0  ;;  %v1055_v22 = vrot.slane %v910_v10, 4  ;;  %v288_v17 = vld [vmem:[%s2890_s5 + $0x6c] sm:$0xf]  ;;  %v2053_v10 = vor.u32 %v2312_v11, %v2050_v16 }
 0x1af   : > { %v2430_v25 = vpack.c.bf16 %v668_v20, %v3020_v39  ;;  %292 = vst [vmem:[#allocation2 + $0x78] sm:$0xf] %v288_v17 }
 0x1b0   : > { %1063 = vst [vmem:[#allocation2 + $0x178] sm:$0xf] %v1055_v22  ;;  %v285_v22 = vld [vmem:[%s2890_s5 + $0x60] sm:$0xf] }
 0x1b1   : > { %2539 = vst [vmem:[#allocation2 + $0x98] sm:$0xff] %v2430_v25   ;;  %v286_v25 = vld [vmem:[%s2890_s5 + $0x64] sm:$0xf] }
 0x1b2   : > { %1618 = vmatpush.bf16.msra.mxu3 %v2049_v15  ;;  %289 = vst [vmem:[#allocation2 + $0x18] sm:$0xf] %v285_v22 }
 0x1b3   : > { %v757_v21 = vpop.f32.mrf.mxu1  ;;  %290 = vst [vmem:[#allocation2 + $0x38] sm:$0xf] %v286_v25 }
 0x1b4   : > { %v912_v32 = vpack.c.bf16 %v757_v21, %v668_v20  ;;  %v2021_v21 = vor.u32 %v2304_v18, %v2018_v19 }
 0x1b5   : > { %v846_v23 = vpop.f32.mrf.mxu2 }
 0x1b6   : > { %v2510_v33 = vpack.c.bf16 %v846_v23, %v3023_v45  ;;  %1619 = vmatpush.bf16.msra.mxu3 %v2017_v29  ;;  %v670_v34 = vpop.f32.mrf.mxu0  ;;  %v1068_v27 = vrot.slane %v912_v32, 4  ;;  %v2317_v60 = vld [vmem:[#allocation2 + $0x74] sm:$0xf0] }
 0x1b7   : > { %v2435_v39 = vpack.c.bf16 %v670_v34, %v3025_v46  ;;  %v2349_v44 = vld [vmem:[#allocation2 + $0x174] sm:$0xf0] }
 0x1b8   : > { %2555 = vst [vmem:[#allocation2 + $0x198] sm:$0xff] %v2510_v33  }
 0x1b9   : > { %2540 = vst [vmem:[#allocation2 + $0xb8] sm:$0xff] %v2435_v39   ;;  %1620 = vmatmul.bf16.vlgmr.msra.gmra.mxu3 %v2953_v6 }
 0x1ba   : > { %1631 = vmatpush.bf16.msrb.mxu3 %v2245_v24  ;;  %1076 = vst [vmem:[#allocation2 + $0x11c] sm:$0xf] %v1068_v27 }
 0x1bb   : > { %v759_v45 = vpop.f32.mrf.mxu1 }
 0x1bc   : > { %v1545_v48 = vpop.f32.mrf.mxu3  ;;  %v914_v49 = vpack.c.bf16 %v759_v45, %v670_v34  ;;  %v2152_v45 = vld [vmem:[#allocation2 + $0x118] sm:$0xf] }
 0x1bd   : > { %v1546_v41 = vadd.f32 %v1545_v48, %v3049_v42  ;;  %v848_v46 = vpop.f32.mrf.mxu2  ;;  %v2341_v48 = vld [vmem:[#allocation2 + $0x134] sm:$0xf0] }
 0x1be   : > { %1632 = vmatpush.bf16.msrb.mxu3 %v2213_v43  ;;  %v2515_v50 = vpack.c.bf16 %v848_v46, %v3029_v53  ;;  %v673_v51 = vpop.f32.mrf.mxu0  ;;  %v1069_v55 = vrot.slane %v914_v49, 4  ;;  %v2184_v43 = vld [vmem:[#allocation2 + $0x158] sm:$0xf] }
 0x1bf   : > { %1688 = vst [vmem:[%s3055_s24] sm:$0xff] %v1546_v41  ;;  %v2440_v56 = vpack.c.bf16 %v673_v51, %v3031_v57  ;;  %v2216_v36 = vld [vmem:[#allocation2 + $0x198] sm:$0xf]  ;;  %v2185_v47 = vor.u32 %v2349_v44, %v2184_v43  ;;  %v2153_v41 = vor.u32 %v2341_v48, %v2152_v45  ;;  %v2353_v12 = vld [vmem:[#allocation2 + $0x19c] sm:$0xf] }
 0x1c0   : > { %2556 = vst [vmem:[#allocation2 + $0x1b8] sm:$0xff] %v2515_v50  }
 0x1c1   : > { %2541 = vst [vmem:[#allocation2 + $0xd8] sm:$0xff] %v2440_v56   ;;  %v2088_v56 = vld [vmem:[#allocation2 + $0x98] sm:$0xf] }
 0x1c2   : > { %1633 = vmatpush.bf16.msrb.mxu3 %v2181_v35  ;;  %1077 = vst [vmem:[#allocation2 + $0x13c] sm:$0xf] %v1069_v55  ;;  %v2325_v55 = vld [vmem:[#allocation2 + $0xb4] sm:$0xf0] }
 0x1c3   : > { %v762_v53 = vpop.f32.mrf.mxu1 }
 0x1c4   : > { %v1547_v61 = vpop.f32.mrf.mxu3  ;;  %v916_v1 = vpack.c.bf16 %v762_v53, %v673_v51 }
 0x1c5   : > { %v1548_v2 = vadd.f32 %v1547_v61, %v3059_v59  ;;  %v851_v3 = vpop.f32.mrf.mxu2  ;;  %v2089_v61 = vor.u32 %v2325_v55, %v2088_v56 }
 0x1c6   : > { %1634 = vmatpush.bf16.msrb.mxu3 %v2149_v58  ;;  %v2520_v57 = vpack.c.bf16 %v851_v3, %v3034_v63  ;;  %v675_v5 = vpop.f32.mrf.mxu0  ;;  %v1070_v7 = vrot.slane %v916_v1, 4  ;;  %v2085_v63 = vor.u32 %v2320_v9, %v2082_v0  ;;  %v2056_v58 = vld [vmem:[#allocation2 + $0x58] sm:$0xf]  ;;  %v294_v1 = vld [vmem:[%s2890_s5 + $0x74] sm:$0xf] }
 0x1c7   : > { %1696 = vst [vmem:[%s3055_s24 + $0x40] sm:$0xff] %v1548_v2  ;;  %v2445_v8 = vpack.c.bf16 %v675_v5, %v3036_v54  ;;  %v2057_v3 = vor.u32 %v2317_v60, %v2056_v58  ;;  %v2218_v16 = vld [vmem:[#allocation2 + $0x1b8] sm:$0xf0] }
 0x1c8   : > { %2557 = vst [vmem:[#allocation2 + $0x1d8] sm:$0xff] %v2520_v57   ;;  %v2120_v50 = vld [vmem:[#allocation2 + $0xd8] sm:$0xf] }
 0x1c9   : > { %2542 = vst [vmem:[#allocation2 + $0xf8] sm:$0xff] %v2445_v8   ;;  %1625 = vmatmul.bf16.gmra.mxu3 %v2970_v38  ;;  %v2309_v57 = vld [vmem:[#allocation2 + $0x34] sm:$0xf0] }
 0x1ca   : > { %1635 = vmatpush.bf16.msrb.mxu3 %v2117_v4  ;;  %1078 = vst [vmem:[#allocation2 + $0x15c] sm:$0xf] %v1070_v7  ;;  %v2024_v4 = vld [vmem:[#allocation2 + $0x18] sm:$0xf] }
 0x1cb   : > { %v764_v54 = vpop.f32.mrf.mxu1  ;;  %298 = vst [vmem:[#allocation2 + $0x3c] sm:$0xf] %v294_v1 }
 0x1cc   : > { %v1550_v20 = vpop.f32.mrf.mxu3  ;;  %v918_v15 = vpack.c.bf16 %v764_v54, %v675_v5  ;;  %v2025_v5 = vor.u32 %v2309_v57, %v2024_v4 }
 0x1cd   : > { %v1551_v26 = vadd.f32 %v1550_v20, %v3065_v14  ;;  %v853_v28 = vpop.f32.mrf.mxu2  ;;  %v2337_v20 = vld [vmem:[#allocation2 + $0x11c] sm:$0xf] }
 0x1ce   : > { %1636 = vmatpush.bf16.msrb.mxu3 %v2085_v63  ;;  %v2525_v29 = vpack.c.bf16 %v853_v28, %v3044_v13  ;;  %v1071_v30 = vrot.slane %v918_v15, 4  ;;  %v2357_v13 = vld [vmem:[#allocation2 + $0x1b4] sm:$0xf0]  ;;  %v2221_v63 = vor.u32 %v2353_v12, %v2218_v16  ;;  %v2154_v15 = vld [vmem:[#allocation2 + $0x138] sm:$0xf0] }
 0x1cf   : > { %1704 = vst [vmem:[%s3055_s24 + $0x80] sm:$0xff] %v1551_v26  ;;  %v2248_v24 = vld [vmem:[#allocation2 + $0x1d8] sm:$0xf]  ;;  %v2217_v39 = vor.u32 %v2357_v13, %v2216_v36  ;;  %v2361_v8 = vld [vmem:[#allocation2 + $0x1dc] sm:$0xf]  ;;  %v2157_v22 = vor.u32 %v2337_v20, %v2154_v15 }
 0x1d0   : > { %2558 = vst [vmem:[#allocation2 + $0x1f8] sm:$0xff] %v2525_v29   ;;  %v2333_v35 = vld [vmem:[#allocation2 + $0xf4] sm:$0xf0]  ;;  %v2122_v25 = vld [vmem:[#allocation2 + $0xf8] sm:$0xf0] }
 0x1d1   : > { %1079 = vst [vmem:[#allocation2 + $0x17c] sm:$0xf] %v1071_v30  ;;  %v2121_v51 = vor.u32 %v2333_v35, %v2120_v50  ;;  %v2345_v17 = vld [vmem:[#allocation2 + $0x15c] sm:$0xf] }
 0x1d2   : > { %1637 = vmatpush.bf16.msrb.mxu3 %v2053_v10  ;;  %v2329_v28 = vld [vmem:[#allocation2 + $0xdc] sm:$0xf] }
 0x1d3   : > { %v2125_v30 = vor.u32 %v2329_v28, %v2122_v25  ;;  %v2305_v36 = vld [vmem:[#allocation2 + $0x1c] sm:$0xf] }
 0x1d4   : > { %v1552_v32 = vpop.f32.mrf.mxu3 }
 0x1d5   : > { %v1553_v23 = vadd.f32 %v1552_v32, %v3075_v31  ;;  %v2321_v32 = vld [vmem:[#allocation2 + $0x9c] sm:$0xf] }
 0x1d6   : > { %1638 = vmatpush.bf16.msrb.mxu3 %v2021_v21  ;;  %v2090_v21 = vld [vmem:[#allocation2 + $0xb8] sm:$0xf0] }
 0x1d7   : > { %1712 = vst [vmem:[%s3055_s24 + $0xc0] sm:$0xff] %v1553_v23  ;;  %v2365_v33 = vld [vmem:[#allocation2 + $0x1f4] sm:$0xf0]  ;;  %v2250_v0 = vld [vmem:[#allocation2 + $0x1f8] sm:$0xf0] }
 0x1d8   : > { %v2249_v34 = vor.u32 %v2365_v33, %v2248_v24  ;;  %v2253_v11 = vor.u32 %v2361_v8, %v2250_v0  ;;  %v2186_v10 = vld [vmem:[#allocation2 + $0x178] sm:$0xf0]  ;;  %v2093_v33 = vor.u32 %v2321_v32, %v2090_v21 }
 0x1d9   : > { %1639 = vmatmul.bf16.vlgmr.msrb.gmra.mxu3 %v2953_v6  ;;  %v2189_v19 = vor.u32 %v2345_v17, %v2186_v10  ;;  %v2313_v23 = vld [vmem:[#allocation2 + $0x5c] sm:$0xf] }
 0x1da   : > { %1650 = vmatpush.bf16.msra.mxu3 %v2249_v34  ;;  %v2058_v24 = vld [vmem:[#allocation2 + $0x78] sm:$0xf0] }
 0x1db   : > { %v2061_v34 = vor.u32 %v2313_v23, %v2058_v24 }
 0x1dc   : > { %v1564_v27 = vpop.f32.mrf.mxu3 }
 0x1dd   : > { %v1565_v40 = vadd.f32 %v1564_v27, %v3049_v42  ;;  %v2026_v27 = vld [vmem:[#allocation2 + $0x38] sm:$0xf0] }
 0x1de   : > { %1651 = vmatpush.bf16.msra.mxu3 %v2217_v39 }
 0x1df   : > { %1689 = vst [vmem:[%s3055_s24 + $0x8] sm:$0xff] %v1565_v40  ;;  %v2029_v40 = vor.u32 %v2305_v36, %v2026_v27 }
 0x1e2   : > { %1652 = vmatpush.bf16.msra.mxu3 %v2185_v47 }
 0x1e4   : > { %v1566_v49 = vpop.f32.mrf.mxu3 }
 0x1e5   : > { %v1567_v46 = vadd.f32 %v1566_v49, %v3059_v59 }
 0x1e6   : > { %1653 = vmatpush.bf16.msra.mxu3 %v2153_v41 }
 0x1e7   : > { %1697 = vst [vmem:[%s3055_s24 + $0x48] sm:$0xff] %v1567_v46 }
 0x1e9   : > { %1644 = vmatmul.bf16.gmra.mxu3 %v2970_v38 }
 0x1ea   : > { %1654 = vmatpush.bf16.msra.mxu3 %v2121_v51 }
 0x1ec   : > { %v1569_v53 = vpop.f32.mrf.mxu3 }
 0x1ed   : > { %v1570_v2 = vadd.f32 %v1569_v53, %v3065_v14 }
 0x1ee   : > { %1655 = vmatpush.bf16.msra.mxu3 %v2089_v61 }
 0x1ef   : > { %1705 = vst [vmem:[%s3055_s24 + $0x88] sm:$0xff] %v1570_v2 }
 0x1f2   : > { %1656 = vmatpush.bf16.msra.mxu3 %v2057_v3 }
 0x1f4   : > { %v1571_v7 = vpop.f32.mrf.mxu3 }
 0x1f5   : > { %v1572_v9 = vadd.f32 %v1571_v7, %v3075_v31 }
 0x1f6   : > { %1657 = vmatpush.bf16.msra.mxu3 %v2025_v5 }
 0x1f7   : > { %1713 = vst [vmem:[%s3055_s24 + $0xc8] sm:$0xff] %v1572_v9 }
 0x1f9   : > { %1658 = vmatmul.bf16.vlgmr.msra.gmra.mxu3 %v2953_v6 }
 0x1fa   : > { %1669 = vmatpush.bf16.msrb.mxu3 %v2253_v11 }
 0x1fc   : > { %v1583_v54 = vpop.f32.mrf.mxu3 }
 0x1fd   : > { %v1584_v18 = vadd.f32 %v1583_v54, %v3049_v42 }
 0x1fe   : > { %1670 = vmatpush.bf16.msrb.mxu3 %v2221_v63 }
 0x1ff   : > { %1690 = vst [vmem:[%s3055_s24 + $0x10] sm:$0xff] %v1584_v18 }
 0x202   : > { %1671 = vmatpush.bf16.msrb.mxu3 %v2189_v19 }
 0x204   : > { %v1585_v26 = vpop.f32.mrf.mxu3 }
 0x205   : > { %v1586_v29 = vadd.f32 %v1585_v26, %v3059_v59 }
 0x206   : > { %1672 = vmatpush.bf16.msrb.mxu3 %v2157_v22 }
 0x207   : > { %1698 = vst [vmem:[%s3055_s24 + $0x50] sm:$0xff] %v1586_v29 }
 0x209   : > { %1663 = vmatmul.bf16.gmra.mxu3 %v2970_v38 }
 0x20a   : > { %1673 = vmatpush.bf16.msrb.mxu3 %v2125_v30 }
 0x20c   : > { %v1588_v13 = vpop.f32.mrf.mxu3 }
 0x20d   : > { %v1589_v39 = vadd.f32 %v1588_v13, %v3065_v14 }
 0x20e   : > { %1674 = vmatpush.bf16.msrb.mxu3 %v2093_v33 }
 0x20f   : > { %1706 = vst [vmem:[%s3055_s24 + $0x90] sm:$0xff] %v1589_v39 }
 0x212   : > { %1675 = vmatpush.bf16.msrb.mxu3 %v2061_v34 }
 0x214   : > { %v1590_v43 = vpop.f32.mrf.mxu3 }
 0x215   : > { %v1591_v44 = vadd.f32 %v1590_v43, %v3075_v31 }
 0x216   : > { %1676 = vmatpush.bf16.msrb.mxu3 %v2029_v40 }
 0x217   : > { %1714 = vst [vmem:[%s3055_s24 + $0xd0] sm:$0xff] %v1591_v44 }
 0x219   : > { %1677 = vmatmul.bf16.vlgmr.msrb.gmra.mxu3 %v2953_v6 }
 0x21c   : > { %v1602_v47 = vpop.f32.mrf.mxu3 }
 0x21d   : > { %v1603_v45 = vadd.f32 %v1602_v47, %v3049_v42 }
 0x21f   : > { %1691 = vst [vmem:[%s3055_s24 + $0x18] sm:$0xff] %v1603_v45 }
 0x224   : > { %v1604_v48 = vpop.f32.mrf.mxu3 }
 0x225   : > { %v1605_v49 = vadd.f32 %v1604_v48, %v3059_v59 }
 0x227   : > { %1699 = vst [vmem:[%s3055_s24 + $0x58] sm:$0xff] %v1605_v49 }
 0x229   : > { %1682 = vmatmul.bf16.gmra.mxu3 %v2970_v38 }
 0x22c   : > { %v1607_v41 = vpop.f32.mrf.mxu3 }
 0x22d   : > { %v1608_v46 = vadd.f32 %v1607_v41, %v3065_v14 }
 0x22f   : > { %1707 = vst [vmem:[%s3055_s24 + $0x98] sm:$0xff] %v1608_v46 }
 0x234   : > { %v1609_v35 = vpop.f32.mrf.mxu3 }
 0x235   : > { %v1610_v6 = vadd.f32 %v1609_v35, %v3075_v31 }
 0x237   : > { %1715 = vst [vmem:[%s3055_s24 + $0xd8] sm:$0xff] %v1610_v6 }
 0x23c   : > { %v1621_v50 = vpop.f32.mrf.mxu3 }
 0x23d   : > { %v1622_v51 = vadd.f32 %v1621_v50, %v3049_v42 }
 0x23f   : > { %1692 = vst [vmem:[%s3055_s24 + $0x20] sm:$0xff] %v1622_v51 }
 0x244   : > { %v1623_v52 = vpop.f32.mrf.mxu3 }
 0x245   : > { %v1624_v37 = vadd.f32 %v1623_v52, %v3059_v59 }
 0x247   : > { %1700 = vst [vmem:[%s3055_s24 + $0x60] sm:$0xff] %v1624_v37 }
 0x24c   : > { %v1626_v38 = vpop.f32.mrf.mxu3 }
 0x24d   : > { %v1627_v55 = vadd.f32 %v1626_v38, %v3065_v14 }
 0x24f   : > { %1708 = vst [vmem:[%s3055_s24 + $0xa0] sm:$0xff] %v1627_v55 }
 0x254   : > { %v1628_v56 = vpop.f32.mrf.mxu3 }
 0x255   : > { %v1629_v58 = vadd.f32 %v1628_v56, %v3075_v31 }
 0x257   : > { %1716 = vst [vmem:[%s3055_s24 + $0xe0] sm:$0xff] %v1629_v58 }
 0x25c   : > { %v1640_v60 = vpop.f32.mrf.mxu3 }
 0x25d   : > { %v1641_v53 = vadd.f32 %v1640_v60, %v3049_v42 }
 0x25f   : > { %1693 = vst [vmem:[%s3055_s24 + $0x28] sm:$0xff] %v1641_v53 }
 0x264   : > { %v1642_v61 = vpop.f32.mrf.mxu3 }
 0x265   : > { %v1643_v62 = vadd.f32 %v1642_v61, %v3059_v59 }
 0x267   : > { %1701 = vst [vmem:[%s3055_s24 + $0x68] sm:$0xff] %v1643_v62 }
 0x26c   : > { %v1645_v1 = vpop.f32.mrf.mxu3 }
 0x26d   : > { %v1646_v2 = vadd.f32 %v1645_v1, %v3065_v14 }
 0x26f   : > { %1709 = vst [vmem:[%s3055_s24 + $0xa8] sm:$0xff] %v1646_v2 }
 0x274   : > { %v1647_v3 = vpop.f32.mrf.mxu3 }
 0x275   : > { %v1648_v4 = vadd.f32 %v1647_v3, %v3075_v31 }
 0x277   : > { %1717 = vst [vmem:[%s3055_s24 + $0xe8] sm:$0xff] %v1648_v4 }
 0x27c   : > { %v1659_v57 = vpop.f32.mrf.mxu3 }
 0x27d   : > { %v1660_v5 = vadd.f32 %v1659_v57, %v3049_v42 }
 0x27f   : > { %1694 = vst [vmem:[%s3055_s24 + $0x30] sm:$0xff] %v1660_v5 }
 0x284   : > { %v1661_v0 = vpop.f32.mrf.mxu3 }
 0x285   : > { %v1662_v7 = vadd.f32 %v1661_v0, %v3059_v59 }
 0x287   : > { %1702 = vst [vmem:[%s3055_s24 + $0x70] sm:$0xff] %v1662_v7 }
 0x28c   : > { %v1664_v8 = vpop.f32.mrf.mxu3 }
 0x28d   : > { %v1665_v9 = vadd.f32 %v1664_v8, %v3065_v14 }
 0x28f   : > { %1710 = vst [vmem:[%s3055_s24 + $0xb0] sm:$0xff] %v1665_v9 }
 0x294   : > { %v1666_v11 = vpop.f32.mrf.mxu3 }
 0x295   : > { %v1667_v16 = vadd.f32 %v1666_v11, %v3075_v31 }
 0x297   : > { %1718 = vst [vmem:[%s3055_s24 + $0xf0] sm:$0xff] %v1667_v16 }
 0x29c   : > { %v1678_v12 = vpop.f32.mrf.mxu3 }
 0x29d   : > { %v1679_v63 = vadd.f32 %v1678_v12, %v3049_v42 }
 0x29f   : > { %1695 = vst [vmem:[%s3055_s24 + $0x38] sm:$0xff] %v1679_v63 }
 0x2a4   : > { %v1680_v17 = vpop.f32.mrf.mxu3 }
 0x2a5   : > { %v1681_v10 = vadd.f32 %v1680_v17, %v3059_v59 }
 0x2a7   : > { %1703 = vst [vmem:[%s3055_s24 + $0x78] sm:$0xff] %v1681_v10 }
 0x2ac   : > { %v1683_v54 = vpop.f32.mrf.mxu3 }
 0x2ad   : > { %v1684_v18 = vadd.f32 %v1683_v54, %v3065_v14 }
 0x2af   : > { %1711 = vst [vmem:[%s3055_s24 + $0xb8] sm:$0xff] %v1684_v18 }
 0x2b4   : > { %v1685_v42 = vpop.f32.mrf.mxu3 }
 0x2b5   : > { %v1686_v19 = vadd.f32 %v1685_v42, %v3075_v31 }
 0x2b7   : > { %1719 = vst [vmem:[%s3055_s24 + $0xf8] sm:$0xff] %v1686_v19 }
 0x2b8   : > { %2713 = shalt.err (!%p2710_p10)
}
 0x2b9   : > { %s2764_s20 = smov 1024   ;;  %s2765_s10 = smov 8192  }
 0x2ba   : > { %s2766_s14 = smov 64  }
 0x2bb   : > { %2565 = dma.vmem_to_hbm [thread:$0]  (%p2858_p5), %s1734_s23, 4096, %s1736_s25, %s1721_s27, %s2764_s20, %s2765_s10, %s2766_s14  }
 0x2bc PF: > { %p2582_p11 = scmp.ge.s32.totalorder %s2756_s18, 2  ;;  %s1750_s24 = sand.u32 1, %s2744_s15  }
 0x2bd   : > { %s1751_s30 = scalar_lea.sflag [#allocation5], %s1750_s24 }
 0x2be   : > { %p2576_p12 = pnand %p2582_p11, %p2827_p6 }
 0x2c0   : > { %p2577_p13 = pneg %p2576_p12 }
 0x2c2   : > { %2739 = dma.done.wait (%p2577_p13), %s1751_s30, 4096  }
 0x2c3   : > { %2741 = vsyncadd (%p2577_p13), %s1751_s30, 4294963200  ;;  %p18_p0 = scmp.ge.s32.totalorder %s2844_s29, 10   ;;  %s3188_s15 = smov %s2748_s16 }
 0x2c4   : > { %s3189_s16 = smov %s2752_s17  ;;  %s3190_s17 = smov %s2854_s8 }
 0x2c5   : > { %s3191_s18 = smov %s2844_s29  ;;  %20 = sbr.rel (!%p18_p0) target bundleno = 6 (0x6), region = 85 }
 0x2ca   :  { %1757 = vsyncpa [#allocation4], 1 }
 0x2cb   :  { %1759 = vsyncpa [#allocation4 + $0x1], 1 }
 0x2cc   :  { %1760 = vsyncpa [#allocation7], 1 }
 0x2cd   :  { %1761 = vsyncpa [#allocation5], 1 }
 0x2ce   :  { %1763 = vsyncpa [#allocation5 + $0x1], 1 }

</bundles_post_ra>
